<compile_context>
chip_gen: v7x
topology: tpu7x:2x2x1
jax: 0.10.0
libtpu: 0.0.40
codegen_flags: <defaults>
</compile_context>

<pallas_src>
import functools

import jax
import jax.numpy as jnp
from jax.experimental import pallas as pl
from jax.experimental.pallas import tpu as pltpu

GEM_EPS = 1e-6  # timm GeM default eps


def _skincoat_kernel(p_ref, x_ref, wft_ref, bf_ref, wl_ref, bl_ref,
                     o_ref, acc_ref, *, s_total):
    # p_ref  : SMEM (1,)        GeM exponent p (learnable scalar, init 3.0)
    # x_ref  : VMEM (1, C, ts)  pixel tile: channels on sublanes, spatial on lanes
    # wft_ref: VMEM (F, C)      backbone stand-in 1x1 conv weight (transposed)
    # bf_ref : VMEM (F, 1)      backbone stand-in conv bias
    # wl_ref : VMEM (F, NCp)    linear head weight (lane-dense padded)
    # bl_ref : VMEM (1, NCp)    linear head bias (padded)
    # o_ref  : VMEM (1, 1, NCp) output block for this batch element
    # acc_ref: VMEM (F, 1) f32  running spatial sum of clamp(relu(conv),eps)**p
    s = pl.program_id(1)

    @pl.when(s == 0)
    def _init():
        acc_ref[...] = jnp.zeros_like(acc_ref)

    p = p_ref[0]
    x = x_ref[0]                       # (C, ts)
    wft = wft_ref[...]                 # (F, C)
    num_ch = x.shape[0]

    # ---- "backbone": pointwise 1x1 conv as unrolled VPU broadcast-FMA ------
    # feat[f, t] = sum_c wft[f, c] * x[c, t]; C is tiny so this stays on the
    # VPU (4 broadcast mul/adds per feat vreg) instead of a K=4 MXU matmul.
    feat = wft[:, 0:1] * x[0:1, :]                      # (F, ts)
    for c in range(1, num_ch):
        feat = feat + wft[:, c:c + 1] * x[c:c + 1, :]

    # bias + ReLU + GeM clamp.  max(relu(y), eps) == max(y, eps) since eps > 0.
    clamped = jnp.maximum(feat + bf_ref[...], GEM_EPS)
    powed = jnp.exp(p * jnp.log(clamped))               # x ** p   (EUP)
    acc_ref[...] += jnp.sum(powed, axis=1, keepdims=True)   # spatial sum (F,1)

    # ---- epilogue: GeM normalize + linear head (runs once per batch elem) --
    @pl.when(s == pl.num_programs(1) - 1)
    def _finalize():
        pooled = acc_ref[...] * (1.0 / s_total)         # spatial mean  (F, 1)
        gem = jnp.exp(jnp.log(pooled) / p)              # pooled ** (1/p)
        # head: out[n] = sum_f gem[f] * wl[f, n]   (F x NCp is tiny)
        out = jnp.sum(gem * wl_ref[...], axis=0, keepdims=True)   # (1, NCp)
        o_ref[0] = out + bl_ref[...]


def _pick_spatial_tile(S):
    # Largest multiple-of-128 tile (<= 512) dividing S; falls back to full S.
    for cand in (512, 256, 128):
        if cand <= S and S % cand == 0:
            return cand
    return S


def skincoat_forward(x_nchw, wf, bf, wl, bl, p):
    """SkinCoat forward.

    x_nchw: (B, C, H, W) f32 images (NCHW, as in the torch module)
    wf:     (C, F)  backbone stand-in 1x1 conv weight
    bf:     (1, F)  backbone stand-in conv bias
    wl:     (F, NC) linear head weight (transposed vs torch nn.Linear)
    bl:     (1, NC) linear head bias
    p:      (1, 1)  GeM exponent
    returns (B, NC) f32 logits
    """
    B, C, H, W = x_nchw.shape
    S = H * W
    F = wf.shape[1]
    NC = wl.shape[1]

    ts = _pick_spatial_tile(S)
    grid = (B, S // ts)

    # Free reshape (no HBM transpose of the image).
    x = x_nchw.reshape(B, C, S)

    # Tiny parameter re-layouts (negligible next to the image traffic).
    wft = jnp.transpose(wf)                       # (F, C)
    bfc = jnp.reshape(bf, (F, 1))                 # (F, 1)
    NCp = ((max(NC, 1) + 127) // 128) * 128       # lane-dense padded head width
    wlp = jnp.pad(wl, ((0, 0), (0, NCp - NC)))    # (F, NCp)
    blp = jnp.pad(jnp.reshape(bl, (1, NC)), ((0, 0), (0, NCp - NC)))
    p_s = jnp.reshape(p, (1,)).astype(jnp.float32)

    out_pad = pl.pallas_call(
        functools.partial(_skincoat_kernel, s_total=S),
        out_shape=jax.ShapeDtypeStruct((B, 1, NCp), jnp.float32),
        grid_spec=pltpu.PrefetchScalarGridSpec(
            num_scalar_prefetch=0,
            grid=grid,
            in_specs=[
                pl.BlockSpec(memory_space=pltpu.MemorySpace.SMEM),   # p scalar
                pl.BlockSpec((1, C, ts), lambda b, s: (b, 0, s)),    # x tile
                pl.BlockSpec((F, C), lambda b, s: (0, 0)),           # wf^T
                pl.BlockSpec((F, 1), lambda b, s: (0, 0)),           # conv bias
                pl.BlockSpec((F, NCp), lambda b, s: (0, 0)),         # head W
                pl.BlockSpec((1, NCp), lambda b, s: (0, 0)),         # head bias
            ],
            out_specs=pl.BlockSpec((1, 1, NCp), lambda b, s: (b, 0, 0)),
            scratch_shapes=[pltpu.VMEM((F, 1), jnp.float32)],
        ),
        compiler_params=pltpu.CompilerParams(
            # batch axis -> parallel (2 TCs on v7x); spatial axis -> reduction.
            dimension_semantics=("parallel", "arbitrary")),
    )(p_s, x, wft, bfc, wlp, blp)

    return out_pad[:, 0, :NC]


def reference_forward(x_nchw, wf, bf, wl, bl, p):
    """Pure-JAX reference for correctness checking."""
    B, C, H, W = x_nchw.shape
    x = jnp.transpose(x_nchw, (0, 2, 3, 1)).reshape(B, H * W, C)
    feat = jnp.maximum(jnp.einsum('bsc,cf->bsf', x, wf) + bf[None, :, :], 0.0)
    pooled = jnp.mean(jnp.clip(feat, GEM_EPS, None) ** p[0, 0], axis=1)
    gem = pooled ** (1.0 / p[0, 0])
    return gem @ wl + bl


if __name__ == "__main__":
    # Small shapes consistent with the module's forward (NCHW images).
    B, C, H, W = 2, 4, 32, 32          # S = 1024 -> 2 spatial reduction steps
    F = 128                            # backbone head.in_features (stand-in)
    NUM_CLASSES = 1

    key = jax.random.PRNGKey(0)
    k_x, k_wf, k_bf, k_wl, k_bl = jax.random.split(key, 5)

    x = jax.random.normal(k_x, (B, C, H, W), dtype=jnp.float32)

    # Deterministic synthetic parameters (no checkpoint loading).
    wf = jax.random.normal(k_wf, (C, F), dtype=jnp.float32) * 0.1
    bf = jax.random.normal(k_bf, (1, F), dtype=jnp.float32) * 0.01
    wl = jax.random.normal(k_wl, (F, NUM_CLASSES), dtype=jnp.float32) * 0.1
    bl = jax.random.normal(k_bl, (1, NUM_CLASSES), dtype=jnp.float32) * 0.01
    p = jnp.full((1, 1), 3.0, dtype=jnp.float32)   # GeM p, torch init = 3.0

    out = skincoat_forward(x, wf, bf, wl, bl, p)
    out = jax.block_until_ready(out)

    ref = reference_forward(x, wf, bf, wl, bl, p)
    assert out.shape == (B, NUM_CLASSES), out.shape
    assert jnp.allclose(out, ref, atol=1e-4, rtol=1e-4), (out, ref)

    print("KERNEL_OK")
</pallas_src>

<mosaic_0001>
module attributes {stable_mosaic.version = 11 : i64} {
  func.func @_skincoat_kernel(%arg0: i32, %arg1: i32, %arg2: memref<1xf32, #tpu.memory_space<smem>>, %arg3: memref<1x4x512xf32, #tpu.memory_space<vmem>>, %arg4: memref<128x4xf32, #tpu.memory_space<vmem>>, %arg5: memref<128x1xf32, #tpu.memory_space<vmem>>, %arg6: memref<128x128xf32, #tpu.memory_space<vmem>>, %arg7: memref<1x128xf32, #tpu.memory_space<vmem>>, %arg8: memref<1x1x128xf32, #tpu.memory_space<vmem>>, %arg9: memref<128x1xf32, #tpu.memory_space<vmem>>) attributes {dimension_semantics = [#tpu.dimension_semantics<parallel>, #tpu.dimension_semantics<arbitrary>], iteration_bounds = array<i64: 2, 2>, scalar_prefetch = 0 : i64, scratch_operands = 1 : i64, tpu.core_type = #tpu.core_type<tc>, window_params = [{transform_indices = @transform_0, window_bounds = array<i64: 1>}, {transform_indices = @transform_1, window_bounds = array<i64: 1, 4, 512>}, {pipeline_mode = #tpu.pipeline_mode<synchronous>, transform_indices = @transform_2, window_bounds = array<i64: 128, 4>}, {pipeline_mode = #tpu.pipeline_mode<synchronous>, transform_indices = @transform_3, window_bounds = array<i64: 128, 1>}, {pipeline_mode = #tpu.pipeline_mode<synchronous>, transform_indices = @transform_4, window_bounds = array<i64: 128, 128>}, {pipeline_mode = #tpu.pipeline_mode<synchronous>, transform_indices = @transform_5, window_bounds = array<i64: 1, 128>}, {transform_indices = @transform_6, window_bounds = array<i64: 1, 1, 128>}]} {
    %c0_i32 = arith.constant 0 : i32
    %0 = arith.cmpi eq, %arg1, %c0_i32 : i32
    %1 = arith.extui %0 : i1 to i32
    %c0_i32_0 = arith.constant 0 : i32
    %2 = arith.cmpi ne, %1, %c0_i32_0 : i32
    scf.if %2 {
      %cst_14 = arith.constant 0.000000e+00 : f32
      %47 = vector.broadcast %cst_14 : f32 to vector<128x1xf32>
      %c0_15 = arith.constant 0 : index
      %c0_16 = arith.constant 0 : index
      %48 = vector.load %arg9[%c0_15, %c0_16] : memref<128x1xf32, #tpu.memory_space<vmem>>, vector<128x1xf32>
      tpu.vector_store %arg9[%c0_15, %c0_16], %47 {strides = array<i32>} : memref<128x1xf32, #tpu.memory_space<vmem>>, vector<128x1xf32>,
    } else {
    }
    %c0 = arith.constant 0 : index
    %3 = memref.load %arg2[%c0] : memref<1xf32, #tpu.memory_space<smem>>
    %c0_1 = arith.constant 0 : index
    %c0_2 = arith.constant 0 : index
    %c0_3 = arith.constant 0 : index
    %4 = vector.load %arg3[%c0_1, %c0_2, %c0_3] : memref<1x4x512xf32, #tpu.memory_space<vmem>>, vector<1x4x512xf32>
    %5 = vector.shape_cast %4 : vector<1x4x512xf32> to vector<4x512xf32>
    %c0_4 = arith.constant 0 : index
    %c0_5 = arith.constant 0 : index
    %6 = vector.load %arg4[%c0_4, %c0_5] : memref<128x4xf32, #tpu.memory_space<vmem>>, vector<128x4xf32>
    %7 = vector.extract_strided_slice %6 {offsets = [0, 0], sizes = [128, 1], strides = [1, 1]} : vector<128x4xf32> to vector<128x1xf32>
    %8 = vector.extract_strided_slice %5 {offsets = [0, 0], sizes = [1, 512], strides = [1, 1]} : vector<4x512xf32> to vector<1x512xf32>
    %9 = vector.broadcast %7 : vector<128x1xf32> to vector<128x512xf32>
    %10 = vector.broadcast %8 : vector<1x512xf32> to vector<128x512xf32>
    %11 = arith.mulf %9, %10 : vector<128x512xf32>
    %12 = vector.extract_strided_slice %6 {offsets = [0, 1], sizes = [128, 1], strides = [1, 1]} : vector<128x4xf32> to vector<128x1xf32>
    %13 = vector.extract_strided_slice %5 {offsets = [1, 0], sizes = [1, 512], strides = [1, 1]} : vector<4x512xf32> to vector<1x512xf32>
    %14 = vector.broadcast %12 : vector<128x1xf32> to vector<128x512xf32>
    %15 = vector.broadcast %13 : vector<1x512xf32> to vector<128x512xf32>
    %16 = arith.mulf %14, %15 : vector<128x512xf32>
    %17 = arith.addf %11, %16 : vector<128x512xf32>
    %18 = vector.extract_strided_slice %6 {offsets = [0, 2], sizes = [128, 1], strides = [1, 1]} : vector<128x4xf32> to vector<128x1xf32>
    %19 = vector.extract_strided_slice %5 {offsets = [2, 0], sizes = [1, 512], strides = [1, 1]} : vector<4x512xf32> to vector<1x512xf32>
    %20 = vector.broadcast %18 : vector<128x1xf32> to vector<128x512xf32>
    %21 = vector.broadcast %19 : vector<1x512xf32> to vector<128x512xf32>
    %22 = arith.mulf %20, %21 : vector<128x512xf32>
    %23 = arith.addf %17, %22 : vector<128x512xf32>
    %24 = vector.extract_strided_slice %6 {offsets = [0, 3], sizes = [128, 1], strides = [1, 1]} : vector<128x4xf32> to vector<128x1xf32>
    %25 = vector.extract_strided_slice %5 {offsets = [3, 0], sizes = [1, 512], strides = [1, 1]} : vector<4x512xf32> to vector<1x512xf32>
    %26 = vector.broadcast %24 : vector<128x1xf32> to vector<128x512xf32>
    %27 = vector.broadcast %25 : vector<1x512xf32> to vector<128x512xf32>
    %28 = arith.mulf %26, %27 : vector<128x512xf32>
    %29 = arith.addf %23, %28 : vector<128x512xf32>
    %c0_6 = arith.constant 0 : index
    %c0_7 = arith.constant 0 : index
    %30 = vector.load %arg5[%c0_6, %c0_7] : memref<128x1xf32, #tpu.memory_space<vmem>>, vector<128x1xf32>
    %31 = vector.broadcast %30 : vector<128x1xf32> to vector<128x512xf32>
    %32 = arith.addf %29, %31 : vector<128x512xf32>
    %cst = arith.constant 9.99999997E-7 : f32
    %33 = vector.broadcast %cst : f32 to vector<128x512xf32>
    %34 = arith.maximumf %32, %33 : vector<128x512xf32>
    %35 = math.log %34 : vector<128x512xf32>
    %36 = vector.broadcast %3 : f32 to vector<128x512xf32>
    %37 = arith.mulf %36, %35 : vector<128x512xf32>
    %38 = math.exp %37 : vector<128x512xf32>
    %c0_8 = arith.constant 0 : index
    %c0_9 = arith.constant 0 : index
    %39 = vector.load %arg9[%c0_8, %c0_9] : memref<128x1xf32, #tpu.memory_space<vmem>>, vector<128x1xf32>
    %cst_10 = arith.constant dense<0.000000e+00> : vector<128xf32>
    %40 = vector.multi_reduction <add>, %38, %cst_10 [1] : vector<128x512xf32> to vector<128xf32>
    %41 = vector.shape_cast %40 : vector<128xf32> to vector<128x1xf32>
    %42 = arith.addf %39, %41 : vector<128x1xf32>
    %c0_11 = arith.constant 0 : index
    %c0_12 = arith.constant 0 : index
    %43 = vector.load %arg9[%c0_11, %c0_12] : memref<128x1xf32, #tpu.memory_space<vmem>>, vector<128x1xf32>
    tpu.vector_store %arg9[%c0_11, %c0_12], %42 {strides = array<i32>} : memref<128x1xf32, #tpu.memory_space<vmem>>, vector<128x1xf32>,
    %c1_i32 = arith.constant 1 : i32
    %44 = arith.cmpi eq, %arg1, %c1_i32 : i32
    %45 = arith.extui %44 : i1 to i32
    %c0_i32_13 = arith.constant 0 : i32
    %46 = arith.cmpi ne, %45, %c0_i32_13 : i32
    scf.if %46 {
      %c0_14 = arith.constant 0 : index
      %c0_15 = arith.constant 0 : index
      %47 = vector.load %arg9[%c0_14, %c0_15] : memref<128x1xf32, #tpu.memory_space<vmem>>, vector<128x1xf32>
      %cst_16 = arith.constant 9.765625E-4 : f32
      %48 = vector.broadcast %cst_16 : f32 to vector<128x1xf32>
      %49 = arith.mulf %47, %48 : vector<128x1xf32>
      %50 = math.log %49 : vector<128x1xf32>
      %51 = vector.broadcast %3 : f32 to vector<128x1xf32>
      %52 = arith.divf %50, %51 : vector<128x1xf32>
      %53 = math.exp %52 : vector<128x1xf32>
      %c0_17 = arith.constant 0 : index
      %c0_18 = arith.constant 0 : index
      %54 = vector.load %arg6[%c0_17, %c0_18] : memref<128x128xf32, #tpu.memory_space<vmem>>, vector<128x128xf32>
      %55 = vector.broadcast %53 : vector<128x1xf32> to vector<128x128xf32>
      %56 = arith.mulf %55, %54 : vector<128x128xf32>
      %cst_19 = arith.constant dense<0.000000e+00> : vector<128xf32>
      %57 = vector.multi_reduction <add>, %56, %cst_19 [0] : vector<128x128xf32> to vector<128xf32>
      %58 = vector.shape_cast %57 : vector<128xf32> to vector<1x128xf32>
      %c0_20 = arith.constant 0 : index
      %c0_21 = arith.constant 0 : index
      %59 = vector.load %arg7[%c0_20, %c0_21] : memref<1x128xf32, #tpu.memory_space<vmem>>, vector<1x128xf32>
      %60 = arith.addf %58, %59 : vector<1x128xf32>
      %c0_22 = arith.constant 0 : index
      %c0_23 = arith.constant 0 : index
      %c0_24 = arith.constant 0 : index
      %61 = vector.load %arg8[%c0_22, %c0_23, %c0_24] : memref<1x1x128xf32, #tpu.memory_space<vmem>>, vector<1x1x128xf32>
      %62 = vector.shape_cast %61 : vector<1x1x128xf32> to vector<1x128xf32>
      %63 = vector.shape_cast %60 : vector<1x128xf32> to vector<1x1x128xf32>
      tpu.vector_store %arg8[%c0_22, %c0_23, %c0_24], %63 {strides = array<i32>} : memref<1x1x128xf32, #tpu.memory_space<vmem>>, vector<1x1x128xf32>,
    } else {
    }
    return
  }
  func.func @transform_0(%arg0: i32, %arg1: i32) -> i32 {
    %c0_i32 = arith.constant 0 : i32
    %c0_i32_0 = arith.constant 0 : i32
    return %c0_i32 : i32
  }
  func.func @transform_1(%arg0: i32, %arg1: i32) -> (i32, i32, i32) {
    %c0_i32 = arith.constant 0 : i32
    %c0_i32_0 = arith.constant 0 : i32
    return %arg0, %c0_i32, %arg1 : i32, i32, i32
  }
  func.func @transform_2(%arg0: i32, %arg1: i32) -> (i32, i32) {
    %c0_i32 = arith.constant 0 : i32
    %c0_i32_0 = arith.constant 0 : i32
    %c0_i32_1 = arith.constant 0 : i32
    return %c0_i32, %c0_i32_0 : i32, i32
  }
  func.func @transform_3(%arg0: i32, %arg1: i32) -> (i32, i32) {
    %c0_i32 = arith.constant 0 : i32
    %c0_i32_0 = arith.constant 0 : i32
    %c0_i32_1 = arith.constant 0 : i32
    return %c0_i32, %c0_i32_0 : i32, i32
  }
  func.func @transform_4(%arg0: i32, %arg1: i32) -> (i32, i32) {
    %c0_i32 = arith.constant 0 : i32
    %c0_i32_0 = arith.constant 0 : i32
    %c0_i32_1 = arith.constant 0 : i32
    return %c0_i32, %c0_i32_0 : i32, i32
  }
  func.func @transform_5(%arg0: i32, %arg1: i32) -> (i32, i32) {
    %c0_i32 = arith.constant 0 : i32
    %c0_i32_0 = arith.constant 0 : i32
    %c0_i32_1 = arith.constant 0 : i32
    return %c0_i32, %c0_i32_0 : i32, i32
  }
  func.func @transform_6(%arg0: i32, %arg1: i32) -> (i32, i32, i32) {
    %c0_i32 = arith.constant 0 : i32
    %c0_i32_0 = arith.constant 0 : i32
    %c0_i32_1 = arith.constant 0 : i32
    return %arg0, %c0_i32, %c0_i32_0 : i32, i32, i32
  }
}

</mosaic_0001>

<bundles_post_ra>
// kernel: tpu_custom_call.1
= control target key start
LH: loop header
LB: loop body
LE: loop exit
PB: predicated region body
PF: predicated region fallthrough
CT: control target
= control target key end

     0   :  { %s4293_s0 = inlined_call_operand.<no memory space> [shape: f32[1], index: 0, kind: input, shape index: {}]   ;;  %s4294_s1 = inlined_call_operand.vmem [shape: f32[2,4,1024], index: 1, kind: input, shape index: {}]   ;;  %s4295_s2 = inlined_call_operand.vmem [shape: f32[128,4], index: 2, kind: input, shape index: {}]   ;;  %s4296_s3 = inlined_call_operand.vmem [shape: f32[128,1], index: 3, kind: input, shape index: {}]   ;;  %s4297_s4 = inlined_call_operand.vmem [shape: f32[128,128], index: 4, kind: input, shape index: {}]   ;;  %s4298_s5 = inlined_call_operand.vmem [shape: f32[1,128], index: 5, kind: input, shape index: {}]   ;;  %s4299_s6 = inlined_call_operand.hbm [shape: f32[2,1,128], index: 6, kind: output, shape index: {}]  }
   0x1   :  { %11 = sst [smem:[#allocation3]] %s4293_s0 }
   0x2   :  { %12 = vsyncpa [#allocation5], 0 }
   0x3   :  { %14 = vsyncpa [#allocation5 + $0x1], 0  ;;  %s2760_s23 = smov 0   ;;  %s2762_s24 = smov 0  }
   0x4   :  { %s2764_s25 = smov 0   ;;  %s2766_s26 = smov 0  }
   0x5   :  { %s2768_s27 = smov 0   ;;  %s2770_s28 = smov 0  }
   0x6   :  { %s2772_s29 = smov 0   ;;  %s2774_s30 = smov 0  }
   0x7 LB: > { %s2196_s0 = sadd.s32 4294967295, %s2713_s30   ;;  %s2197_s7 = sadd.s32 4294967294, %s2713_s30   ;;  %s2713_s30 = sphi %s2774_s30, %s20_s30   ;;  %s2709_s29 = sphi %s2772_s29, %s4562_s29   ;;  %s2705_s28 = sphi %s2770_s28, %s4561_s28   ;;  %s2701_s27 = sphi %s2768_s27, %s4560_s27   ;;  %s2697_s26 = sphi %s2766_s26, %s4559_s26   ;;  %s2693_s25 = sphi %s2764_s25, %s4558_s25   ;;  %s2689_s24 = sphi %s2762_s24, %s4557_s24   ;;  %s2685_s23 = sphi %s2760_s23, %s4556_s23  }
   0x8   : > { %s29_s8 = sadd.s32 1, %s2705_s28  ;;  %s32_s9 = sadd.s32 1, %s2709_s29 }
   0x9   : > { %p30_p0 = scmp.ge.s32.totalorder %s29_s8, 2  ;;  %p182_p1 = scmp.ne.s32.totalorder %s2693_s25, %s2689_s24 }
   0xa   : > { %p183_p2 = scmp.eq.s32.totalorder %s2196_s0, 3  ;;  %p188_p4 = scmp.ne.s32.totalorder %s2689_s24, %s2685_s23 }
   0xb   : > { %s4564_s8 = smov (%p30_p0, %s29_s8), 0  ;;  %s4566_s9 = smov (!%p30_p0, %s32_s9), %s2709_s29 }
   0xc   : > { %p2809_p3 = por %p183_p2, %p182_p1  ;;  %p34_p5 = scmp.ge.s32.totalorder %s4566_s9, 2 }
   0xd   : > { %p189_p6 = scmp.eq.s32.totalorder %s2197_s7, 3  ;;  %p2200_p7 = scmp.ge.s32.totalorder %s2713_s30, 1 }
   0xe   : > { %p235_p8 = scmp.lt.s32.totalorder %s2713_s30, 5  ;;  %s4568_s9 = smov (%p34_p5, %s4566_s9), 0 }
   0xf   : > { %p2819_p9 = por %p189_p6, %p188_p4  ;;  %s169_s12 = ssub.s32 %s2709_s29, %s4568_s9 }
  0x10   : > { %p236_p10 = pnand %p2200_p7, %p235_p8  ;;  %s172_s13 = sadd.s32 1, %s2693_s25 }
  0x11   : > { %p170_p11 = scmp.eq.s32.totalorder %s169_s12, 0 }
  0x12   : > { %239 = sbr.rel (%p236_p10) target bundleno = 844 (0x34c), region = 44 }
  0x13   : > { %s2827_s14 = scalar_select %p170_p11, %s2693_s25, %s172_s13  }
  0x19   : > { %s266_s15 = sand.u32 1, %s2689_s24   ;;  %s2201_s16 = sshll.u32 %s2697_s26, 2 }
  0x1a   : > { %p269_p12 = scmp.lt.s32.totalorder %s2701_s27, 1  ;;  %p271_p13 = scmp.lt.s32.totalorder %s2201_s16, 7 }
  0x1b   : > { %s2840_s7 = scalar_lea.vmem [#allocation4], %s266_s15  ;;  %p2204_p0 = scmp.ne.s32.totalorder %s2697_s26, 0 }
  0x1c   : > { %s270_s17 = scalar_select %p269_p12, %s2701_s27, 1 }
  0x1d   : > { %s4570_s16 = smov (!%p271_p13, %s2201_s16), 7  ;;  %281 = sbr.rel (%p2204_p0) target bundleno = 39 (0x27), region = 48 }
  0x1e   : > { %s2202_s18 = sshll.u32 %s270_s17, 3  ;;  %vm282_vm0 = vcmask (!%p2204_p0), 7168   ;;  %v2715_v0 = vmov (!%p2204_p0), 0.0  }
  0x1f   : > { %s274_s19 = sadd.s32 %s2202_s18, %s4570_s16  ;;  %283 = vst.msk [vmem:[#allocation2] sm:$0xff] (!%p2204_p0), %vm282_vm0, %v2715_v0  ;;  %284 = vst.msk [vmem:[#allocation2 + $0x8] sm:$0xff] (!%p2204_p0), %vm282_vm0, %v2715_v0 }
  0x20   : > { %s2203_s20 = sshll.u32 %s274_s19, 2  ;;  %285 = vst.msk [vmem:[#allocation2 + $0x10] sm:$0xff] (!%p2204_p0), %vm282_vm0, %v2715_v0  ;;  %286 = vst.msk [vmem:[#allocation2 + $0x18] sm:$0xff] (!%p2204_p0), %vm282_vm0, %v2715_v0 }
  0x21   : > { %s2836_s0 = scalar_lea.vmem %s4294_s1, %s2203_s20  ;;  %287 = vst.msk [vmem:[#allocation2 + $0x20] sm:$0xff] (!%p2204_p0), %vm282_vm0, %v2715_v0  ;;  %288 = vst.msk [vmem:[#allocation2 + $0x28] sm:$0xff] (!%p2204_p0), %vm282_vm0, %v2715_v0 }
  0x22   : > { %289 = vst.msk [vmem:[#allocation2 + $0x30] sm:$0xff] (!%p2204_p0), %vm282_vm0, %v2715_v0  ;;  %290 = vst.msk [vmem:[#allocation2 + $0x38] sm:$0xff] (!%p2204_p0), %vm282_vm0, %v2715_v0 }
  0x23   : > { %291 = vst.msk [vmem:[#allocation2 + $0x40] sm:$0xff] (!%p2204_p0), %vm282_vm0, %v2715_v0  ;;  %292 = vst.msk [vmem:[#allocation2 + $0x48] sm:$0xff] (!%p2204_p0), %vm282_vm0, %v2715_v0 }
  0x24   : > { %293 = vst.msk [vmem:[#allocation2 + $0x50] sm:$0xff] %vm282_vm0, %v2715_v0  ;;  %294 = vst.msk [vmem:[#allocation2 + $0x58] sm:$0xff] %vm282_vm0, %v2715_v0 }
  0x25   : > { %295 = vst.msk [vmem:[#allocation2 + $0x60] sm:$0xff] %vm282_vm0, %v2715_v0  ;;  %296 = vst.msk [vmem:[#allocation2 + $0x68] sm:$0xff] %vm282_vm0, %v2715_v0 }
  0x26   : > { %297 = vst.msk [vmem:[#allocation2 + $0x70] sm:$0xff] %vm282_vm0, %v2715_v0  ;;  %298 = vst.msk [vmem:[#allocation2 + $0x78] sm:$0xff] %vm282_vm0, %v2715_v0 }
  0x27 PF: > { %v2862_v1 = vld [vmem:[%s4295_s2 + $0x10] sm:$0xff]  ;;  %v2867_v2 = vld [vmem:[%s4295_s2] sm:$0xff]  ;;  %v2716_v3 = vmov 1   ;;  %v2717_v4 = vmov 0   ;;  %v305_v5 = vld [vmem:[%s4295_s2 + $0x18] sm:$0xff]  ;;  %v2718_v13 = vmov 2   ;;  %v400_v21 = vlaneseq }
  0x28   : > { %2287 = vset.pattern.permute.xlu0 %v2716_v3  ;;  %2286 = vset.pattern.permute.xlu1 %v2717_v4  ;;  %v307_v6 = vld [vmem:[%s4295_s2 + $0x28] sm:$0xff]  ;;  %v309_v7 = vld [vmem:[%s4295_s2 + $0x38] sm:$0xff]  ;;  %v306_v14 = vld [vmem:[%s4295_s2 + $0x20] sm:$0xff]  ;;  %v2719_v20 = vmov 3   ;;  %vm1841_vm1 = vcmask 7168   ;;  %p2205_p1 = scmp.ne.s32.totalorder %s2697_s26, 1 }
  0x29   : > { %330 = vperm.xlu1 %2286, %v2862_v1   ;;  %501 = vperm.xlu0 %2287, %v2867_v2   ;;  %v311_v8 = vld [vmem:[%s4295_s2 + $0x48] sm:$0xff]  ;;  %v313_v9 = vld [vmem:[%s4295_s2 + $0x58] sm:$0xff]  ;;  %v308_v15 = vld [vmem:[%s4295_s2 + $0x30] sm:$0xff]  ;;  %v2925_v22 = vshrl.u32 %v400_v21, 7 }
  0x2a   : > { %v315_v10 = vld [vmem:[%s4295_s2 + $0x68] sm:$0xff]  ;;  %v317_v11 = vld [vmem:[%s4295_s2 + $0x78] sm:$0xff]  ;;  %v310_v16 = vld [vmem:[%s4295_s2 + $0x40] sm:$0xff] }
  0x2b   : > { %v303_v12 = vld [vmem:[%s4295_s2 + $0x8] sm:$0xff]  ;;  %v312_v17 = vld [vmem:[%s4295_s2 + $0x50] sm:$0xff]  ;;  %v314_v18 = vld [vmem:[%s4295_s2 + $0x60] sm:$0xff]  ;;  %v566_v23 = vsub.s32 1, %v2925_v22  ;;  %v570_v24 = vsub.s32 5, %v2925_v22  ;;  %v402_v25 = vsub.s32 0, %v2925_v22 }
  0x2c   : > { %v2915_v19 = vld [vmem:[%s4295_s2 + $0x70] sm:$0xff]  ;;  %v406_v26 = vsub.s32 4, %v2925_v22  ;;  %v2933_v27 = vld [vmem:[%s2836_s0] sm:$0xff]  ;;  %v2936_v28 = vld [vmem:[%s2836_s0 + $0x8] sm:$0xff]  ;;  %s299_s0 = sld [smem:[#allocation3]] }
  0x2d   : > { %335 = vperm.xlu1 %2286, %v305_v5   ;;  %513 = vperm.xlu0 %2287, %v305_v5   ;;  %v1185_v29 = vld [vmem:[%s4296_s3 + $0x8] sm:$0xff]  ;;  %v567_v30 = vrot.slane %v2933_v27, %v566_v23  ;;  %v571_v31 = vrot.slane %v2933_v27, %v570_v24  ;;  %v575_v32 = vrot.slane %v2936_v28, %v566_v23  ;;  %v1188_v40 = vld [vmem:[%s4296_s3 + $0x20] sm:$0xff]  ;;  %v1190_v59 = vld [vmem:[%s4296_s3 + $0x30] sm:$0xff] }
  0x2e   : > { %v579_v33 = vrot.slane %v2936_v28, %v570_v24  ;;  %v403_v34 = vrot.slane %v2933_v27, %v402_v25  ;;  %v407_v35 = vrot.slane %v2933_v27, %v406_v26  ;;  %v411_v36 = vrot.slane %v2936_v28, %v402_v25  ;;  %v1184_v60 = vld [vmem:[%s4296_s3] sm:$0xff] }
  0x2f   : > { %v415_v37 = vrot.slane %v2936_v28, %v406_v26  ;;  %v2956_v41 = vrot.slane %v567_v30, %v566_v23  ;;  %v2958_v42 = vrot.slane %v571_v31, %v566_v23  ;;  %v2960_v43 = vrot.slane %v575_v32, %v566_v23  ;;  %v1194_v30 = vld [vmem:[%s4296_s3 + $0x50] sm:$0xff]  ;;  %v1187_v31 = vld [vmem:[%s4296_s3 + $0x18] sm:$0xff] }
  0x30   : > { %v2962_v44 = vrot.slane %v579_v33, %v566_v23  ;;  %v2964_v45 = vrot.slane %v403_v34, %v402_v25  ;;  %v2966_v46 = vrot.slane %v407_v35, %v402_v25  ;;  %v2968_v47 = vrot.slane %v411_v36, %v402_v25 }
  0x31   : > { %345 = vperm.xlu1 %2286, %v307_v6   ;;  %521 = vperm.xlu0 %2287, %v307_v6   ;;  %v2970_v48 = vrot.slane %v415_v37, %v402_v25 }
  0x35   : > { %355 = vperm.xlu1 %2286, %v309_v7   ;;  %529 = vperm.xlu0 %2287, %v309_v7  }
  0x39   : > { %365 = vperm.xlu1 %2286, %v311_v8   ;;  %537 = vperm.xlu0 %2287, %v311_v8  }
  0x3d   : > { %375 = vperm.xlu1 %2286, %v313_v9   ;;  %545 = vperm.xlu0 %2287, %v313_v9  }
  0x41   : > { %385 = vperm.xlu1 %2286, %v315_v10   ;;  %553 = vperm.xlu0 %2287, %v315_v10  }
  0x45   : > { %395 = vperm.xlu1 %2286, %v317_v11   ;;  %561 = vperm.xlu0 %2287, %v317_v11  }
  0x49   : > { %2288 = vset.pattern.permute.xlu1 %v2716_v3  ;;  %2290 = vset.pattern.permute.xlu0 %v2718_v13 }
  0x4a   : > { %505 = vperm.xlu1 %2288, %v303_v12   ;;  %733 = vperm.xlu0 %2290, %v303_v12  }
  0x4e   : > { %509 = vperm.xlu1 %2288, %v2862_v1   ;;  %745 = vperm.xlu0 %2290, %v306_v14  }
  0x52   : > { %517 = vperm.xlu1 %2288, %v306_v14   ;;  %753 = vperm.xlu0 %2290, %v308_v15  }
  0x56   : > { %525 = vperm.xlu1 %2288, %v308_v15   ;;  %761 = vperm.xlu0 %2290, %v310_v16  }
  0x5a   : > { %533 = vperm.xlu1 %2288, %v310_v16   ;;  %769 = vperm.xlu0 %2290, %v312_v17  }
  0x5e   : > { %541 = vperm.xlu1 %2288, %v312_v17   ;;  %777 = vperm.xlu0 %2290, %v314_v18  }
  0x62   : > { %549 = vperm.xlu1 %2288, %v314_v18   ;;  %785 = vperm.xlu0 %2290, %v2915_v19  }
  0x66   : > { %557 = vperm.xlu1 %2288, %v2915_v19   ;;  %2291 = vset.pattern.permute.xlu0 %v2719_v20 }
  0x67   : > { %957 = vperm.xlu0 %2291, %v2867_v2  }
  0x6a   : > { %2289 = vset.pattern.permute.xlu1 %v2718_v13 }
  0x6b   : > { %729 = vperm.xlu1 %2289, %v2867_v2   ;;  %969 = vperm.xlu0 %2291, %v305_v5  }
  0x6f   : > { %737 = vperm.xlu1 %2289, %v2862_v1   ;;  %977 = vperm.xlu0 %2291, %v307_v6  }
  0x73   : > { %741 = vperm.xlu1 %2289, %v305_v5   ;;  %985 = vperm.xlu0 %2291, %v309_v7  }
  0x77   : > { %749 = vperm.xlu1 %2289, %v307_v6   ;;  %993 = vperm.xlu0 %2291, %v311_v8  }
  0x7b   : > { %757 = vperm.xlu1 %2289, %v309_v7   ;;  %1001 = vperm.xlu0 %2291, %v313_v9  }
  0x7f   : > { %765 = vperm.xlu1 %2289, %v311_v8   ;;  %1009 = vperm.xlu0 %2291, %v315_v10  }
  0x83   : > { %773 = vperm.xlu1 %2289, %v313_v9   ;;  %1017 = vperm.xlu0 %2291, %v317_v11  }
  0x87   : > { %781 = vperm.xlu1 %2289, %v315_v10   ;;  %2293 = vset.pattern.permute.xlu0 %v2717_v4 }
  0x88   : > { %320 = vperm.xlu0 %2293, %v2867_v2  }
  0x8b   : > { %789 = vperm.xlu1 %2289, %v317_v11  }
  0x8c   : > { %325 = vperm.xlu0 %2293, %v303_v12  }
  0x8f   : > { %2292 = vset.pattern.permute.xlu1 %v2719_v20 }
  0x90   : > { %961 = vperm.xlu1 %2292, %v303_v12   ;;  %340 = vperm.xlu0 %2293, %v306_v14   ;;  %v1186_v12 = vld [vmem:[%s4296_s3 + $0x10] sm:$0xff] }
  0x94   : > { %965 = vperm.xlu1 %2292, %v2862_v1   ;;  %350 = vperm.xlu0 %2293, %v308_v15  }
  0x98   : > { %973 = vperm.xlu1 %2292, %v306_v14   ;;  %360 = vperm.xlu0 %2293, %v310_v16  }
  0x9c   : > { %981 = vperm.xlu1 %2292, %v308_v15   ;;  %370 = vperm.xlu0 %2293, %v312_v17  }
  0xa0   : > { %989 = vperm.xlu1 %2292, %v310_v16   ;;  %380 = vperm.xlu0 %2293, %v314_v18  }
  0xa4   : > { %997 = vperm.xlu1 %2292, %v312_v17   ;;  %390 = vperm.xlu0 %2293, %v2915_v19  }
  0xa8   : > { %v2949_v38 = vpop.permute.xlu1 %330  ;;  %1005 = vperm.xlu1 %2292, %v314_v18   ;;  %1207 = vperm.xlu0 %2293, %v1185_v29   ;;  %v2951_v39 = vpop.permute.xlu0 %501 }
  0xac   : > { %v336_v49 = vpop.permute.xlu1 %335  ;;  %1013 = vperm.xlu1 %2292, %v2915_v19   ;;  %1222 = vperm.xlu0 %2293, %v1188_v40   ;;  %v514_v50 = vpop.permute.xlu0 %513 }
  0xad   : > { %v448_v51 = vmul.f32 %v2964_v45, %v336_v49  ;;  %v449_v52 = vmul.f32 %v2966_v46, %v336_v49  ;;  %v450_v53 = vmul.f32 %v2968_v47, %v336_v49  ;;  %v451_v54 = vmul.f32 %v2970_v48, %v336_v49 }
  0xae   : > { %v612_v55 = vmul.f32 %v2956_v41, %v514_v50  ;;  %v613_v56 = vmul.f32 %v2958_v42, %v514_v50  ;;  %v614_v57 = vmul.f32 %v2960_v43, %v514_v50  ;;  %v615_v58 = vmul.f32 %v2962_v44, %v514_v50 }
  0xb0   : > { %v2987_v61 = vadd.f32 %v612_v55, %v448_v51  ;;  %v2989_v62 = vadd.f32 %v613_v56, %v449_v52  ;;  %v2991_v63 = vadd.f32 %v614_v57, %v450_v53  ;;  %v2993_v0 = vadd.f32 %v615_v58, %v451_v54  ;;  %v346_v1 = vpop.permute.xlu1 %345  ;;  %2294 = vset.pattern.permute.xlu1 %v2717_v4  ;;  %v522_v2 = vpop.permute.xlu0 %521  ;;  %v1192_v4 = vld [vmem:[%s4296_s3 + $0x40] sm:$0xff]  ;;  %v1189_v57 = vld [vmem:[%s4296_s3 + $0x28] sm:$0xff] }
  0xb1   : > { %v456_v3 = vmul.f32 %v2964_v45, %v346_v1  ;;  %v457_v5 = vmul.f32 %v2966_v46, %v346_v1  ;;  %v458_v6 = vmul.f32 %v2968_v47, %v346_v1  ;;  %v459_v7 = vmul.f32 %v2970_v48, %v346_v1  ;;  %1232 = vperm.xlu0 %2293, %v1190_v59   ;;  %v1196_v56 = vld [vmem:[%s4296_s3 + $0x60] sm:$0xff] }
  0xb2   : > { %v620_v8 = vmul.f32 %v2956_v41, %v522_v2  ;;  %v621_v9 = vmul.f32 %v2958_v42, %v522_v2  ;;  %v622_v10 = vmul.f32 %v2960_v43, %v522_v2  ;;  %v623_v11 = vmul.f32 %v2962_v44, %v522_v2  ;;  %1202 = vperm.xlu1 %2294, %v1184_v60  }
  0xb4   : > { %v3010_v13 = vadd.f32 %v620_v8, %v456_v3  ;;  %v3012_v14 = vadd.f32 %v621_v9, %v457_v5  ;;  %v3014_v15 = vadd.f32 %v622_v10, %v458_v6  ;;  %v3016_v16 = vadd.f32 %v623_v11, %v459_v7  ;;  %v356_v17 = vpop.permute.xlu1 %355  ;;  %v530_v18 = vpop.permute.xlu0 %529 }
  0xb5   : > { %v464_v19 = vmul.f32 %v2964_v45, %v356_v17  ;;  %v465_v20 = vmul.f32 %v2966_v46, %v356_v17  ;;  %v466_v21 = vmul.f32 %v2968_v47, %v356_v17  ;;  %v467_v23 = vmul.f32 %v2970_v48, %v356_v17  ;;  %1242 = vperm.xlu0 %2293, %v1192_v4   ;;  %v1191_v17 = vld [vmem:[%s4296_s3 + $0x38] sm:$0xff] }
  0xb6   : > { %v628_v24 = vmul.f32 %v2956_v41, %v530_v18  ;;  %v629_v25 = vmul.f32 %v2958_v42, %v530_v18  ;;  %v630_v26 = vmul.f32 %v2960_v43, %v530_v18  ;;  %v631_v29 = vmul.f32 %v2962_v44, %v530_v18  ;;  %1212 = vperm.xlu1 %2294, %v1186_v12   ;;  %v1198_v12 = vld [vmem:[%s4296_s3 + $0x70] sm:$0xff] }
  0xb8   : > { %v3032_v32 = vadd.f32 %v628_v24, %v464_v19  ;;  %v3034_v33 = vadd.f32 %v629_v25, %v465_v20  ;;  %v3036_v34 = vadd.f32 %v630_v26, %v466_v21  ;;  %v3038_v35 = vadd.f32 %v631_v29, %v467_v23  ;;  %v366_v36 = vpop.permute.xlu1 %365  ;;  %v538_v37 = vpop.permute.xlu0 %537 }
  0xb9   : > { %v472_v40 = vmul.f32 %v2964_v45, %v366_v36  ;;  %v473_v49 = vmul.f32 %v2966_v46, %v366_v36  ;;  %v474_v50 = vmul.f32 %v2968_v47, %v366_v36  ;;  %v475_v51 = vmul.f32 %v2970_v48, %v366_v36  ;;  %1252 = vperm.xlu0 %2293, %v1194_v30  }
  0xba   : > { %v636_v52 = vmul.f32 %v2956_v41, %v538_v37  ;;  %v637_v53 = vmul.f32 %v2958_v42, %v538_v37  ;;  %v638_v54 = vmul.f32 %v2960_v43, %v538_v37  ;;  %v639_v55 = vmul.f32 %v2962_v44, %v538_v37  ;;  %1217 = vperm.xlu1 %2294, %v1187_v31  }
  0xbc   : > { %v3054_v58 = vadd.f32 %v636_v52, %v472_v40  ;;  %v3056_v59 = vadd.f32 %v637_v53, %v473_v49  ;;  %v3058_v60 = vadd.f32 %v638_v54, %v474_v50  ;;  %v3060_v1 = vadd.f32 %v639_v55, %v475_v51  ;;  %v376_v2 = vpop.permute.xlu1 %375  ;;  %v546_v3 = vpop.permute.xlu0 %545  ;;  %v1193_v49 = vld [vmem:[%s4296_s3 + $0x48] sm:$0xff] }
  0xbd   : > { %v480_v5 = vmul.f32 %v2964_v45, %v376_v2  ;;  %v481_v6 = vmul.f32 %v2966_v46, %v376_v2  ;;  %v482_v7 = vmul.f32 %v2968_v47, %v376_v2  ;;  %v483_v8 = vmul.f32 %v2970_v48, %v376_v2  ;;  %1262 = vperm.xlu0 %2293, %v1196_v56  }
  0xbe   : > { %v644_v9 = vmul.f32 %v2956_v41, %v546_v3  ;;  %v645_v10 = vmul.f32 %v2958_v42, %v546_v3  ;;  %v646_v11 = vmul.f32 %v2960_v43, %v546_v3  ;;  %v647_v4 = vmul.f32 %v2962_v44, %v546_v3  ;;  %1227 = vperm.xlu1 %2294, %v1189_v57  }
  0xc0   : > { %v3076_v18 = vadd.f32 %v644_v9, %v480_v5  ;;  %v3078_v19 = vadd.f32 %v645_v10, %v481_v6  ;;  %v3080_v20 = vadd.f32 %v646_v11, %v482_v7  ;;  %v3082_v21 = vadd.f32 %v647_v4, %v483_v8  ;;  %v386_v23 = vpop.permute.xlu1 %385  ;;  %v554_v24 = vpop.permute.xlu0 %553  ;;  %v1195_v9 = vld [vmem:[%s4296_s3 + $0x58] sm:$0xff] }
  0xc1   : > { %v488_v25 = vmul.f32 %v2964_v45, %v386_v23  ;;  %v489_v26 = vmul.f32 %v2966_v46, %v386_v23  ;;  %v490_v29 = vmul.f32 %v2968_v47, %v386_v23  ;;  %v491_v30 = vmul.f32 %v2970_v48, %v386_v23  ;;  %1272 = vperm.xlu0 %2293, %v1198_v12  }
  0xc2   : > { %4303 = vst [vmem:[#allocation7_spill] sm:$0xff] %v3076_v18  ;;  %4304 = vst [vmem:[#allocation8_spill] sm:$0xff] %v3078_v19  ;;  %v652_v31 = vmul.f32 %v2956_v41, %v554_v24  ;;  %v653_v36 = vmul.f32 %v2958_v42, %v554_v24  ;;  %v654_v37 = vmul.f32 %v2960_v43, %v554_v24  ;;  %1237 = vperm.xlu1 %2294, %v1191_v17  }
  0xc3   : > { %v655_v40 = vmul.f32 %v2962_v44, %v554_v24  ;;  %v1197_v24 = vld [vmem:[%s4296_s3 + $0x68] sm:$0xff] }
  0xc4   : > { %v3095_v50 = vadd.f32 %v652_v31, %v488_v25  ;;  %v3097_v51 = vadd.f32 %v653_v36, %v489_v26  ;;  %v3099_v52 = vadd.f32 %v654_v37, %v490_v29  ;;  %v396_v54 = vpop.permute.xlu1 %395  ;;  %v562_v55 = vpop.permute.xlu0 %561  ;;  %v444_v25 = vmul.f32 %v2964_v45, %v2949_v38 }
  0xc5   : > { %v3101_v53 = vadd.f32 %v655_v40, %v491_v30  ;;  %v496_v56 = vmul.f32 %v2964_v45, %v396_v54  ;;  %v497_v57 = vmul.f32 %v2966_v46, %v396_v54  ;;  %v498_v2 = vmul.f32 %v2968_v47, %v396_v54 }
  0xc6   : > { %4305 = vst [vmem:[#allocation9_spill] sm:$0xff] %v3095_v50  ;;  %4306 = vst [vmem:[#allocation10_spill] sm:$0xff] %v3097_v51  ;;  %v499_v3 = vmul.f32 %v2970_v48, %v396_v54  ;;  %v660_v5 = vmul.f32 %v2956_v41, %v562_v55  ;;  %v661_v6 = vmul.f32 %v2958_v42, %v562_v55  ;;  %1247 = vperm.xlu1 %2294, %v1193_v49  }
  0xc7   : > { %v662_v7 = vmul.f32 %v2960_v43, %v562_v55  ;;  %v663_v8 = vmul.f32 %v2962_v44, %v562_v55  ;;  %v445_v26 = vmul.f32 %v2966_v46, %v2949_v38  ;;  %v446_v29 = vmul.f32 %v2968_v47, %v2949_v38  ;;  %v1199_v55 = vld [vmem:[%s4296_s3 + $0x78] sm:$0xff] }
  0xc8   : > { %v3114_v10 = vadd.f32 %v660_v5, %v496_v56  ;;  %v3116_v11 = vadd.f32 %v661_v6, %v497_v57  ;;  %v447_v30 = vmul.f32 %v2970_v48, %v2949_v38  ;;  %v794_v6 = vsub.s32 2, %v2925_v22 }
  0xc9   : > { %v3118_v4 = vadd.f32 %v662_v7, %v498_v2  ;;  %v3120_v12 = vadd.f32 %v663_v8, %v499_v3  ;;  %v506_v17 = vpop.permute.xlu1 %505  ;;  %v3122_v23 = vpop.permute.xlu0 %733 }
  0xca   : > { %4307 = vst [vmem:[#allocation11_spill] sm:$0xff] %v3114_v10  ;;  %4308 = vst [vmem:[#allocation12_spill] sm:$0xff] %v3116_v11  ;;  %1257 = vperm.xlu1 %2294, %v1195_v9   ;;  %v798_v9 = vsub.s32 6, %v2925_v22 }
  0xcb   : > { %4309 = vst [vmem:[#allocation13_spill] sm:$0xff] %v3118_v4  ;;  %4310 = vst [vmem:[#allocation14_spill] sm:$0xff] %v3120_v12 }
  0xcd   : > { %v510_v31 = vpop.permute.xlu1 %509  ;;  %v746_v36 = vpop.permute.xlu0 %745 }
  0xce   : > { %v608_v37 = vmul.f32 %v2956_v41, %v510_v31  ;;  %v609_v40 = vmul.f32 %v2958_v42, %v510_v31  ;;  %v610_v49 = vmul.f32 %v2960_v43, %v510_v31  ;;  %v611_v54 = vmul.f32 %v2962_v44, %v510_v31  ;;  %1267 = vperm.xlu1 %2294, %v1197_v24  }
  0xcf   : > { %v1022_v24 = vsub.s32 3, %v2925_v22 }
  0xd0   : > { %v3142_v56 = vadd.f32 %v608_v37, %v444_v25  ;;  %v3144_v57 = vadd.f32 %v609_v40, %v445_v26  ;;  %v3146_v38 = vadd.f32 %v610_v49, %v446_v29  ;;  %v3148_v2 = vadd.f32 %v611_v54, %v447_v30 }
  0xd1   : > { %v518_v3 = vpop.permute.xlu1 %517  ;;  %v754_v5 = vpop.permute.xlu0 %753  ;;  %v1026_v25 = vsub.s32 7, %v2925_v22  ;;  %v795_v26 = vrot.slane %v2933_v27, %v794_v6  ;;  %v799_v30 = vrot.slane %v2933_v27, %v798_v9  ;;  %v803_v37 = vrot.slane %v2936_v28, %v794_v6 }
  0xd2   : > { %1277 = vperm.xlu1 %2294, %v1199_v55   ;;  %v807_v40 = vrot.slane %v2936_v28, %v798_v9  ;;  %v1023_v49 = vrot.slane %v2933_v27, %v1022_v24  ;;  %v1031_v55 = vrot.slane %v2936_v28, %v1022_v24  ;;  %v3174_v9 = vmul.f32 %v2956_v41, %v2951_v39 }
  0xd3   : > { %v1027_v54 = vrot.slane %v2933_v27, %v1026_v25  ;;  %v1035_v11 = vrot.slane %v2936_v28, %v1026_v25  ;;  %v3162_v22 = vrot.slane %v795_v26, %v794_v6  ;;  %v3164_v50 = vrot.slane %v799_v30, %v794_v6 }
  0xd4   : > { %v3166_v12 = vrot.slane %v803_v37, %v794_v6  ;;  %v3168_v4 = vrot.slane %v807_v40, %v794_v6  ;;  %v3170_v19 = vrot.slane %v1023_v49, %v1022_v24  ;;  %v3178_v18 = vrot.slane %v1031_v55, %v1022_v24 }
  0xd5   : > { %v526_v7 = vpop.permute.xlu1 %525  ;;  %v762_v8 = vpop.permute.xlu0 %761  ;;  %v3176_v27 = vrot.slane %v1027_v54, %v1022_v24  ;;  %v3180_v28 = vrot.slane %v1035_v11, %v1022_v24  ;;  %v3184_v25 = vmul.f32 %v2958_v42, %v2951_v39  ;;  %v3188_v6 = vmul.f32 %v2960_v43, %v2951_v39 }
  0xd6   : > { %v3192_v26 = vmul.f32 %v2962_v44, %v2951_v39  ;;  %v3194_v30 = vstv %s299_s0  ;;  %v3197_v37 = vmul.f32 %v2956_v41, %v506_v17  ;;  %v3200_v11 = vmul.f32 %v2958_v42, %v506_v17 }
  0xd7   : > { %4311 = vst [vmem:[#allocation15_spill] sm:$0xff] %v3194_v30  ;;  %v3203_v24 = vmul.f32 %v2960_v43, %v506_v17  ;;  %v3206_v40 = vmul.f32 %v2962_v44, %v506_v17  ;;  %v3210_v39 = vmul.f32 %v3162_v22, %v3122_v23  ;;  %v3214_v55 = vmul.f32 %v3164_v50, %v3122_v23 }
  0xd8   : > { %4312 = vst [vmem:[#allocation16_spill] sm:$0xff] %v3197_v37  ;;  %4313 = vst [vmem:[#allocation17_spill] sm:$0xff] %v3200_v11  ;;  %v3218_v30 = vmul.f32 %v3166_v12, %v3122_v23  ;;  %v3225_v17 = vmul.f32 %v3162_v22, %v746_v36  ;;  %v3234_v11 = vmul.f32 %v3168_v4, %v746_v36 }
  0xd9   : > { %v534_v29 = vpop.permute.xlu1 %533  ;;  %v770_v31 = vpop.permute.xlu0 %769  ;;  %4314 = vst [vmem:[#allocation18_spill] sm:$0xff] %v3203_v24  ;;  %4315 = vst [vmem:[#allocation19_spill] sm:$0xff] %v3206_v40  ;;  %v3222_v24 = vmul.f32 %v3168_v4, %v3122_v23  ;;  %v3228_v40 = vmul.f32 %v3164_v50, %v746_v36  ;;  %v3243_v23 = vmul.f32 %v2960_v43, %v518_v3 }
  0xda   : > { %4316 = vst [vmem:[#allocation20_spill] sm:$0xff] %v3210_v39  ;;  %4317 = vst [vmem:[#allocation21_spill] sm:$0xff] %v3214_v55  ;;  %v3231_v39 = vmul.f32 %v3166_v12, %v746_v36  ;;  %v3237_v55 = vmul.f32 %v2956_v41, %v518_v3  ;;  %v3255_v36 = vmul.f32 %v3166_v12, %v754_v5 }
  0xdb   : > { %4318 = vst [vmem:[#allocation22_spill] sm:$0xff] %v3218_v30  ;;  %4319 = vst [vmem:[#allocation23_spill] sm:$0xff] %v3222_v24  ;;  %v3240_v30 = vmul.f32 %v2958_v42, %v518_v3 }
  0xdc   : > { %4320 = vst [vmem:[#allocation24_spill] sm:$0xff] %v3225_v17  ;;  %4321 = vst [vmem:[#allocation25_spill] sm:$0xff] %v3228_v40  ;;  %v3246_v17 = vmul.f32 %v2962_v44, %v518_v3  ;;  %v3249_v40 = vmul.f32 %v3162_v22, %v754_v5  ;;  %v3267_v3 = vmul.f32 %v2960_v43, %v526_v7 }
  0xdd   : > { %v542_v10 = vpop.permute.xlu1 %541  ;;  %v778_v51 = vpop.permute.xlu0 %777  ;;  %4322 = vst [vmem:[#allocation26_spill] sm:$0xff] %v3231_v39  ;;  %4323 = vst [vmem:[#allocation27_spill] sm:$0xff] %v3234_v11  ;;  %v3252_v39 = vmul.f32 %v3164_v50, %v754_v5  ;;  %v3258_v11 = vmul.f32 %v3168_v4, %v754_v5  ;;  %v3276_v5 = vmul.f32 %v3164_v50, %v762_v8 }
  0xde   : > { %4324 = vst [vmem:[#allocation28_spill] sm:$0xff] %v3237_v55  ;;  %4325 = vst [vmem:[#allocation29_spill] sm:$0xff] %v3240_v30  ;;  %v3261_v30 = vmul.f32 %v2956_v41, %v526_v7 }
  0xdf   : > { %4326 = vst [vmem:[#allocation30_spill] sm:$0xff] %v3243_v23  ;;  %4327 = vst [vmem:[#allocation31_spill] sm:$0xff] %v3246_v17  ;;  %v3264_v23 = vmul.f32 %v2958_v42, %v526_v7  ;;  %v3273_v17 = vmul.f32 %v3162_v22, %v762_v8 }
  0xe0   : > { %4328 = vst [vmem:[#allocation32_spill] sm:$0xff] %v3249_v40  ;;  %4329 = vst [vmem:[#allocation33_spill] sm:$0xff] %v3252_v39  ;;  %v3270_v40 = vmul.f32 %v2962_v44, %v526_v7  ;;  %v3291_v7 = vmul.f32 %v2960_v43, %v534_v29 }
  0xe1   : > { %v550_v49 = vpop.permute.xlu1 %549  ;;  %v786_v54 = vpop.permute.xlu0 %785  ;;  %4330 = vst [vmem:[#allocation34_spill] sm:$0xff] %v3255_v36  ;;  %4331 = vst [vmem:[#allocation35_spill] sm:$0xff] %v3258_v11  ;;  %v3279_v11 = vmul.f32 %v3166_v12, %v762_v8  ;;  %v3282_v36 = vmul.f32 %v3168_v4, %v762_v8  ;;  %v3303_v8 = vmul.f32 %v3166_v12, %v770_v31 }
  0xe2   : > { %4332 = vst [vmem:[#allocation36_spill] sm:$0xff] %v3261_v30  ;;  %4333 = vst [vmem:[#allocation37_spill] sm:$0xff] %v3264_v23  ;;  %v3285_v23 = vmul.f32 %v2956_v41, %v534_v29 }
  0xe3   : > { %4334 = vst [vmem:[#allocation38_spill] sm:$0xff] %v3267_v3  ;;  %4335 = vst [vmem:[#allocation39_spill] sm:$0xff] %v3270_v40  ;;  %v3288_v3 = vmul.f32 %v2958_v42, %v534_v29 }
  0xe4   : > { %4336 = vst [vmem:[#allocation40_spill] sm:$0xff] %v3273_v17  ;;  %4337 = vst [vmem:[#allocation41_spill] sm:$0xff] %v3276_v5  ;;  %v3294_v17 = vmul.f32 %v2962_v44, %v534_v29  ;;  %v3297_v5 = vmul.f32 %v3162_v22, %v770_v31  ;;  %v3315_v29 = vmul.f32 %v2960_v43, %v542_v10 }
  0xe5   : > { %v558_v55 = vpop.permute.xlu1 %557  ;;  %4338 = vst [vmem:[#allocation42_spill] sm:$0xff] %v3279_v11  ;;  %4339 = vst [vmem:[#allocation43_spill] sm:$0xff] %v3282_v36  ;;  %v3300_v11 = vmul.f32 %v3164_v50, %v770_v31  ;;  %v3306_v36 = vmul.f32 %v3168_v4, %v770_v31  ;;  %v3324_v31 = vmul.f32 %v3164_v50, %v778_v51 }
  0xe6   : > { %v958_v39 = vpop.permute.xlu0 %957  ;;  %4340 = vst [vmem:[#allocation44_spill] sm:$0xff] %v3285_v23  ;;  %4341 = vst [vmem:[#allocation45_spill] sm:$0xff] %v3288_v3  ;;  %v3309_v3 = vmul.f32 %v2956_v41, %v542_v10  ;;  %v3321_v23 = vmul.f32 %v3162_v22, %v778_v51 }
  0xe7   : > { %4342 = vst [vmem:[#allocation46_spill] sm:$0xff] %v3291_v7  ;;  %4343 = vst [vmem:[#allocation47_spill] sm:$0xff] %v3294_v17  ;;  %v3312_v7 = vmul.f32 %v2958_v42, %v542_v10 }
  0xe8   : > { %4344 = vst [vmem:[#allocation48_spill] sm:$0xff] %v3297_v5  ;;  %4345 = vst [vmem:[#allocation49_spill] sm:$0xff] %v3300_v11  ;;  %v3318_v5 = vmul.f32 %v2962_v44, %v542_v10  ;;  %v3336_v10 = vmul.f32 %v2958_v42, %v550_v49 }
  0xe9   : > { %4346 = vst [vmem:[#allocation50_spill] sm:$0xff] %v3303_v8  ;;  %4347 = vst [vmem:[#allocation51_spill] sm:$0xff] %v3306_v36  ;;  %v3327_v36 = vmul.f32 %v3166_v12, %v778_v51  ;;  %v3330_v8 = vmul.f32 %v3168_v4, %v778_v51  ;;  %v3351_v51 = vmul.f32 %v3166_v12, %v786_v54 }
  0xea   : > { %4348 = vst [vmem:[#allocation52_spill] sm:$0xff] %v3309_v3  ;;  %4349 = vst [vmem:[#allocation53_spill] sm:$0xff] %v3312_v7  ;;  %v730_v17 = vpop.permute.xlu1 %729  ;;  %v970_v11 = vpop.permute.xlu0 %969  ;;  %v3333_v7 = vmul.f32 %v2956_v41, %v550_v49 }
  0xeb   : > { %4350 = vst [vmem:[#allocation54_spill] sm:$0xff] %v3315_v29  ;;  %4351 = vst [vmem:[#allocation55_spill] sm:$0xff] %v3318_v5  ;;  %v3339_v5 = vmul.f32 %v2960_v43, %v550_v49 }
  0xec   : > { %4352 = vst [vmem:[#allocation56_spill] sm:$0xff] %v3321_v23  ;;  %4353 = vst [vmem:[#allocation57_spill] sm:$0xff] %v3324_v31  ;;  %v3342_v23 = vmul.f32 %v2962_v44, %v550_v49  ;;  %v3345_v31 = vmul.f32 %v3162_v22, %v786_v54  ;;  %v3363_v49 = vmul.f32 %v2960_v43, %v558_v55 }
  0xed   : > { %4354 = vst [vmem:[#allocation58_spill] sm:$0xff] %v3327_v36  ;;  %4355 = vst [vmem:[#allocation59_spill] sm:$0xff] %v3330_v8  ;;  %v3348_v36 = vmul.f32 %v3164_v50, %v786_v54  ;;  %v3354_v8 = vmul.f32 %v3168_v4, %v786_v54  ;;  %v3372_v54 = vmul.f32 %v3176_v27, %v958_v39 }
  0xee   : > { %4356 = vst [vmem:[#allocation60_spill] sm:$0xff] %v3333_v7  ;;  %4357 = vst [vmem:[#allocation61_spill] sm:$0xff] %v3336_v10  ;;  %v3357_v10 = vmul.f32 %v2956_v41, %v558_v55  ;;  %v3369_v7 = vmul.f32 %v3170_v19, %v958_v39  ;;  %v3380_v43 = vmul.f32 %v3180_v28, %v958_v39 }
  0xef   : > { %4358 = vst [vmem:[#allocation62_spill] sm:$0xff] %v3339_v5  ;;  %4359 = vst [vmem:[#allocation63_spill] sm:$0xff] %v3342_v23  ;;  %v3360_v5 = vmul.f32 %v2958_v42, %v558_v55  ;;  %v738_v23 = vpop.permute.xlu1 %737  ;;  %v3377_v42 = vmul.f32 %v3178_v18, %v958_v39  ;;  %v1068_v39 = vmul.f32 %v3170_v19, %v970_v11 }
  0xf0   : > { %4360 = vst [vmem:[#allocation64_spill] sm:$0xff] %v3345_v31  ;;  %4361 = vst [vmem:[#allocation65_spill] sm:$0xff] %v3348_v36  ;;  %v3366_v31 = vmul.f32 %v2962_v44, %v558_v55  ;;  %v978_v36 = vpop.permute.xlu0 %977  ;;  %v838_v41 = vmul.f32 %v3166_v12, %v738_v23  ;;  %v3383_v44 = vmul.f32 %v3162_v22, %v730_v17 }
  0xf1   : > { %4362 = vst [vmem:[#allocation66_spill] sm:$0xff] %v3351_v51  ;;  %4363 = vst [vmem:[#allocation67_spill] sm:$0xff] %v3354_v8  ;;  %v839_v8 = vmul.f32 %v3168_v4, %v738_v23  ;;  %v3386_v55 = vmul.f32 %v3164_v50, %v730_v17  ;;  %v3389_v51 = vmul.f32 %v3166_v12, %v730_v17 }
  0xf2   : > { %4364 = vst [vmem:[#allocation68_spill] sm:$0xff] %v3357_v10  ;;  %4365 = vst [vmem:[#allocation69_spill] sm:$0xff] %v3360_v5  ;;  %v1079_v3 = vmul.f32 %v3180_v28, %v978_v36 }
  0xf3   : > { %4366 = vst [vmem:[#allocation70_spill] sm:$0xff] %v3363_v49  ;;  %4367 = vst [vmem:[#allocation71_spill] sm:$0xff] %v3366_v31  ;;  %v836_v31 = vmul.f32 %v3162_v22, %v738_v23  ;;  %v837_v49 = vmul.f32 %v3164_v50, %v738_v23  ;;  %v742_v5 = vpop.permute.xlu1 %741  ;;  %v1078_v23 = vmul.f32 %v3178_v18, %v978_v36 }
  0xf4   : > { %4368 = vst [vmem:[#allocation72_spill] sm:$0xff] %v3369_v7  ;;  %4369 = vst [vmem:[#allocation73_spill] sm:$0xff] %v3372_v54  ;;  %v3392_v54 = vmul.f32 %v3168_v4, %v730_v17  ;;  %v3395_v7 = vadd.f32 %v838_v41, %v3146_v38  ;;  %v986_v10 = vpop.permute.xlu0 %985  ;;  %v840_v29 = vmul.f32 %v3162_v22, %v742_v5 }
  0xf5   : > { %4370 = vst [vmem:[#allocation74_spill] sm:$0xff] %v3377_v42  ;;  %4371 = vst [vmem:[#allocation75_spill] sm:$0xff] %v3380_v43  ;;  %v3398_v42 = vadd.f32 %v839_v8, %v3148_v2  ;;  %v1069_v43 = vmul.f32 %v3176_v27, %v970_v11  ;;  %v841_v17 = vmul.f32 %v3164_v50, %v742_v5 }
  0xf6   : > { %4372 = vst [vmem:[#allocation76_spill] sm:$0xff] %v3383_v44  ;;  %4373 = vst [vmem:[#allocation77_spill] sm:$0xff] %v3386_v55  ;;  %v842_v38 = vmul.f32 %v3166_v12, %v742_v5  ;;  %v843_v41 = vmul.f32 %v3168_v4, %v742_v5  ;;  %v1070_v2 = vmul.f32 %v3178_v18, %v970_v11 }
  0xf7   : > { %4374 = vst [vmem:[#allocation78_spill] sm:$0xff] %v3389_v51  ;;  %4375 = vst [vmem:[#allocation79_spill] sm:$0xff] %v3392_v54  ;;  %v1071_v8 = vmul.f32 %v3180_v28, %v970_v11  ;;  %v3417_v24 = vadd.f32 %v836_v31, %v3142_v56  ;;  %v3420_v5 = vadd.f32 %v837_v49, %v3144_v57  ;;  %v750_v44 = vpop.permute.xlu1 %749 }
  0xf8   : > { %4376 = vst [vmem:[#allocation80_spill] sm:$0xff] %v3395_v7  ;;  %4377 = vst [vmem:[#allocation81_spill] sm:$0xff] %v3398_v42  ;;  %v1076_v42 = vmul.f32 %v3170_v19, %v978_v36  ;;  %v1077_v7 = vmul.f32 %v3176_v27, %v978_v36  ;;  %v906_v40 = vadd.f32 %v842_v38, %v2991_v63  ;;  %v994_v54 = vpop.permute.xlu0 %993 }
  0xf9   : > { %v907_v30 = vadd.f32 %v843_v41, %v2993_v0  ;;  %4378 = vst [vmem:[#allocation82_spill] sm:$0xff] %v3417_v24  ;;  %4379 = vst [vmem:[#allocation83_spill] sm:$0xff] %v3420_v5  ;;  %v904_v11 = vadd.f32 %v840_v29, %v2987_v61  ;;  %v905_v55 = vadd.f32 %v841_v17, %v2989_v62 }
  0xfa   : > { %v848_v51 = vmul.f32 %v3162_v22, %v750_v44  ;;  %v849_v36 = vmul.f32 %v3164_v50, %v750_v44  ;;  %v850_v63 = vmul.f32 %v3166_v12, %v750_v44  ;;  %v851_v0 = vmul.f32 %v3168_v4, %v750_v44 }
  0xfb   : > { %v1084_v56 = vmul.f32 %v3170_v19, %v986_v10  ;;  %v1085_v31 = vmul.f32 %v3176_v27, %v986_v10  ;;  %v1086_v57 = vmul.f32 %v3178_v18, %v986_v10  ;;  %v1087_v61 = vmul.f32 %v3180_v28, %v986_v10  ;;  %v758_v38 = vpop.permute.xlu1 %757 }
  0xfc   : > { %v912_v62 = vadd.f32 %v848_v51, %v3010_v13  ;;  %v913_v29 = vadd.f32 %v849_v36, %v3012_v14  ;;  %v914_v49 = vadd.f32 %v850_v63, %v3014_v15  ;;  %v915_v17 = vadd.f32 %v851_v0, %v3016_v16  ;;  %v1002_v41 = vpop.permute.xlu0 %1001 }
  0xfd   : > { %v3436_v5 = vadd.f32 %v1068_v39, %v904_v11  ;;  %v3438_v44 = vadd.f32 %v1069_v43, %v905_v55  ;;  %v3440_v24 = vadd.f32 %v1070_v2, %v906_v40  ;;  %v3442_v37 = vadd.f32 %v1071_v8, %v907_v30 }
  0xfe   : > { %v856_v10 = vmul.f32 %v3162_v22, %v758_v38  ;;  %v857_v13 = vmul.f32 %v3164_v50, %v758_v38  ;;  %v858_v14 = vmul.f32 %v3166_v12, %v758_v38  ;;  %v859_v15 = vmul.f32 %v3168_v4, %v758_v38 }
  0xff   : > { %4380 = vst [vmem:[#allocation84_spill] sm:$0xff] %v3436_v5  ;;  %4381 = vst [vmem:[#allocation85_spill] sm:$0xff] %v3438_v44  ;;  %v1092_v16 = vmul.f32 %v3170_v19, %v994_v54  ;;  %v1093_v51 = vmul.f32 %v3176_v27, %v994_v54  ;;  %v1094_v39 = vmul.f32 %v3178_v18, %v994_v54  ;;  %v766_v8 = vpop.permute.xlu1 %765 }
 0x100   : > { %4382 = vst [vmem:[#allocation86_spill] sm:$0xff] %v3440_v24  ;;  %4383 = vst [vmem:[#allocation87_spill] sm:$0xff] %v3442_v37  ;;  %v1095_v43 = vmul.f32 %v3180_v28, %v994_v54  ;;  %v920_v40 = vadd.f32 %v856_v10, %v3032_v32  ;;  %v921_v30 = vadd.f32 %v857_v13, %v3034_v33  ;;  %v1010_v11 = vpop.permute.xlu0 %1009 }
 0x101   : > { %v922_v55 = vadd.f32 %v858_v14, %v3036_v34  ;;  %v923_v2 = vadd.f32 %v859_v15, %v3038_v35  ;;  %v3456_v36 = vadd.f32 %v1076_v42, %v912_v62  ;;  %v3458_v63 = vadd.f32 %v1077_v7, %v913_v29 }
 0x102   : > { %v3460_v0 = vadd.f32 %v1078_v23, %v914_v49  ;;  %v3462_v38 = vadd.f32 %v1079_v3, %v915_v17  ;;  %v864_v54 = vmul.f32 %v3162_v22, %v766_v8  ;;  %v865_v32 = vmul.f32 %v3164_v50, %v766_v8 }
 0x103   : > { %4384 = vst [vmem:[#allocation88_spill] sm:$0xff] %v3456_v36  ;;  %4385 = vst [vmem:[#allocation89_spill] sm:$0xff] %v3458_v63  ;;  %v866_v33 = vmul.f32 %v3166_v12, %v766_v8  ;;  %v867_v34 = vmul.f32 %v3168_v4, %v766_v8  ;;  %v3469_v35 = vmul.f32 %v3170_v19, %v1002_v41  ;;  %v774_v17 = vpop.permute.xlu1 %773 }
 0x104   : > { %4386 = vst [vmem:[#allocation90_spill] sm:$0xff] %v3460_v0  ;;  %4387 = vst [vmem:[#allocation91_spill] sm:$0xff] %v3462_v38  ;;  %v3472_v42 = vmul.f32 %v3176_v27, %v1002_v41  ;;  %v3475_v7 = vmul.f32 %v3178_v18, %v1002_v41  ;;  %v3478_v3 = vmul.f32 %v3180_v28, %v1002_v41  ;;  %v1018_v10 = vpop.permute.xlu0 %1017 }
 0x105   : > { %4388 = vst [vmem:[#allocation92_spill] sm:$0xff] %v3469_v35  ;;  %v928_v23 = vadd.f32 %v864_v54, %v3054_v58  ;;  %v929_v62 = vadd.f32 %v865_v32, %v3056_v59  ;;  %v930_v29 = vadd.f32 %v866_v33, %v3058_v60  ;;  %v931_v49 = vadd.f32 %v867_v34, %v3060_v1 }
 0x106   : > { %4389 = vst [vmem:[#allocation93_spill] sm:$0xff] %v3472_v42  ;;  %4390 = vst [vmem:[#allocation94_spill] sm:$0xff] %v3475_v7  ;;  %v3484_v13 = vadd.f32 %v1084_v56, %v920_v40  ;;  %v3486_v14 = vadd.f32 %v1085_v31, %v921_v30  ;;  %v3488_v15 = vadd.f32 %v1086_v57, %v922_v55 }
 0x107   : > { %4391 = vst [vmem:[#allocation95_spill] sm:$0xff] %v3478_v3  ;;  %v3490_v8 = vadd.f32 %v1087_v61, %v923_v2  ;;  %v3493_v41 = vmul.f32 %v3170_v19, %v1010_v11  ;;  %v3496_v58 = vmul.f32 %v3176_v27, %v1010_v11  ;;  %v874_v59 = vmul.f32 %v3166_v12, %v774_v17  ;;  %v782_v2 = vpop.permute.xlu1 %781 }
 0x108   : > { %4392 = vst [vmem:[#allocation96_spill] sm:$0xff] %v3484_v13  ;;  %4393 = vst [vmem:[#allocation97_spill] sm:$0xff] %v3486_v14  ;;  %v875_v60 = vmul.f32 %v3168_v4, %v774_v17  ;;  %v3501_v1 = vmul.f32 %v3178_v18, %v1010_v11  ;;  %v3504_v56 = vmul.f32 %v3180_v28, %v1010_v11  ;;  %v4458_v13 = vld [vmem:[#allocation54_spill] sm:$0xff] }
 0x109   : > { %4394 = vst [vmem:[#allocation98_spill] sm:$0xff] %v3488_v15  ;;  %4395 = vst [vmem:[#allocation99_spill] sm:$0xff] %v3490_v8  ;;  %v872_v31 = vmul.f32 %v3162_v22, %v774_v17  ;;  %v873_v57 = vmul.f32 %v3164_v50, %v774_v17  ;;  %v3509_v61 = vadd.f32 %v874_v59, %v3080_v20  ;;  %v321_v59 = vpop.permute.xlu0 %320  ;;  %v4456_v8 = vld [vmem:[#allocation52_spill] sm:$0xff]  ;;  %v4457_v15 = vld [vmem:[#allocation53_spill] sm:$0xff] }
 0x10a   : > { %4396 = vst [vmem:[#allocation100_spill] sm:$0xff] %v3493_v41  ;;  %4397 = vst [vmem:[#allocation101_spill] sm:$0xff] %v3496_v58  ;;  %v3512_v40 = vadd.f32 %v875_v60, %v3082_v21  ;;  %v3515_v30 = vmul.f32 %v3170_v19, %v1018_v10  ;;  %v3518_v55 = vmul.f32 %v3176_v27, %v1018_v10  ;;  %v4424_v58 = vld [vmem:[#allocation9_spill] sm:$0xff] }
 0x10b   : > { %4398 = vst [vmem:[#allocation102_spill] sm:$0xff] %v3501_v1  ;;  %4399 = vst [vmem:[#allocation103_spill] sm:$0xff] %v3504_v56  ;;  %v3520_v54 = vadd.f32 %v1092_v16, %v928_v23  ;;  %v3522_v11 = vadd.f32 %v1093_v51, %v929_v62  ;;  %v3524_v32 = vadd.f32 %v1094_v39, %v930_v29 }
 0x10c   : > { %4400 = vst [vmem:[#allocation104_spill] sm:$0xff] %v3509_v61  ;;  %4401 = vst [vmem:[#allocation105_spill] sm:$0xff] %v3512_v40  ;;  %v3526_v33 = vadd.f32 %v1095_v43, %v931_v49  ;;  %v3529_v20 = vmul.f32 %v3178_v18, %v1018_v10  ;;  %v3532_v21 = vmul.f32 %v3180_v28, %v1018_v10  ;;  %v4445_v40 = vld [vmem:[#allocation37_spill] sm:$0xff]  ;;  %v4446_v61 = vld [vmem:[#allocation38_spill] sm:$0xff] }
 0x10d   : > { %4402 = vst [vmem:[#allocation106_spill] sm:$0xff] %v3515_v30  ;;  %4403 = vst [vmem:[#allocation107_spill] sm:$0xff] %v3518_v55  ;;  %v882_v34 = vmul.f32 %v3166_v12, %v782_v2  ;;  %v883_v17 = vmul.f32 %v3168_v4, %v782_v2  ;;  %v436_v16 = vmul.f32 %v2964_v45, %v321_v59  ;;  %v790_v55 = vpop.permute.xlu1 %789 }
 0x10e   : > { %4404 = vst [vmem:[#allocation108_spill] sm:$0xff] %v3520_v54  ;;  %4405 = vst [vmem:[#allocation109_spill] sm:$0xff] %v3522_v11  ;;  %v437_v51 = vmul.f32 %v2966_v46, %v321_v59  ;;  %v438_v39 = vmul.f32 %v2968_v47, %v321_v59  ;;  %v439_v43 = vmul.f32 %v2970_v48, %v321_v59 }
 0x10f   : > { %4406 = vst [vmem:[#allocation110_spill] sm:$0xff] %v3524_v32  ;;  %4407 = vst [vmem:[#allocation111_spill] sm:$0xff] %v3526_v33  ;;  %v880_v23 = vmul.f32 %v3162_v22, %v782_v2  ;;  %v881_v62 = vmul.f32 %v3164_v50, %v782_v2  ;;  %v3543_v29 = vadd.f32 %v882_v34, %v3099_v52  ;;  %v326_v34 = vpop.permute.xlu0 %325  ;;  %v4452_v33 = vld [vmem:[#allocation44_spill] sm:$0xff] }
 0x110   : > { %4408 = vst [vmem:[#allocation112_spill] sm:$0xff] %v3529_v20  ;;  %4409 = vst [vmem:[#allocation113_spill] sm:$0xff] %v3532_v21  ;;  %v3546_v49 = vadd.f32 %v883_v17, %v3101_v53  ;;  %v664_v10 = vadd.f32 %v3174_v9, %v436_v16  ;;  %v665_v60 = vadd.f32 %v3184_v25, %v437_v51  ;;  %v4412_v17 = vld [vmem:[#allocation7_spill] sm:$0xff]  ;;  %v4414_v16 = vld [vmem:[#allocation8_spill] sm:$0xff] }
 0x111   : > { %4410 = vst [vmem:[#allocation114_spill] sm:$0xff] %v3543_v29  ;;  %v666_v21 = vadd.f32 %v3188_v6, %v438_v39  ;;  %v667_v20 = vadd.f32 %v3192_v26, %v439_v43  ;;  %v888_v59 = vmul.f32 %v3162_v22, %v790_v55  ;;  %v889_v30 = vmul.f32 %v3164_v50, %v790_v55  ;;  %v4416_v50 = vld [vmem:[#allocation13_spill] sm:$0xff]  ;;  %v4423_v29 = vld [vmem:[#allocation19_spill] sm:$0xff] }
 0x112   : > { %4411 = vst [vmem:[#allocation115_spill] sm:$0xff] %v3546_v49  ;;  %v890_v2 = vmul.f32 %v3166_v12, %v790_v55  ;;  %v891_v52 = vmul.f32 %v3168_v4, %v790_v55  ;;  %v440_v53 = vmul.f32 %v2964_v45, %v326_v34  ;;  %v441_v9 = vmul.f32 %v2966_v46, %v326_v34  ;;  %v4418_v12 = vld [vmem:[#allocation14_spill] sm:$0xff]  ;;  %v4420_v55 = vld [vmem:[#allocation16_spill] sm:$0xff]  ;;  %v4421_v43 = vld [vmem:[#allocation17_spill] sm:$0xff] }
 0x113   : > { %v442_v25 = vmul.f32 %v2968_v47, %v326_v34  ;;  %v443_v6 = vmul.f32 %v2970_v48, %v326_v34  ;;  %v3561_v26 = vadd.f32 %v872_v31, %v4412_v17  ;;  %v3564_v22 = vadd.f32 %v873_v57, %v4414_v16  ;;  %v4422_v49 = vld [vmem:[#allocation18_spill] sm:$0xff]  ;;  %v962_v16 = vpop.permute.xlu1 %961 }
 0x114   : > { %v3567_v51 = vadd.f32 %v890_v2, %v4416_v50  ;;  %v3570_v4 = vadd.f32 %v891_v52, %v4418_v12  ;;  %v668_v39 = vadd.f32 %v4420_v55, %v440_v53  ;;  %v669_v56 = vadd.f32 %v4421_v43, %v441_v9  ;;  %v4426_v17 = vld [vmem:[#allocation10_spill] sm:$0xff]  ;;  %v341_v2 = vpop.permute.xlu0 %340  ;;  %v4429_v52 = vld [vmem:[#allocation79_spill] sm:$0xff]  ;;  %v4436_v43 = vld [vmem:[#allocation20_spill] sm:$0xff] }
 0x115   : > { %4413 = vst [vmem:[#allocation7_spill] sm:$0xff] %v3561_v26  ;;  %4415 = vst [vmem:[#allocation8_spill] sm:$0xff] %v3564_v22  ;;  %v670_v1 = vadd.f32 %v4422_v49, %v442_v25  ;;  %v671_v34 = vadd.f32 %v4423_v29, %v443_v6  ;;  %v3577_v31 = vadd.f32 %v880_v23, %v4424_v58  ;;  %v4428_v50 = vld [vmem:[#allocation78_spill] sm:$0xff]  ;;  %v4430_v53 = vld [vmem:[#allocation11_spill] sm:$0xff] }
 0x116   : > { %4417 = vst [vmem:[#allocation13_spill] sm:$0xff] %v3567_v51  ;;  %4419 = vst [vmem:[#allocation14_spill] sm:$0xff] %v3570_v4  ;;  %v3580_v57 = vadd.f32 %v881_v62, %v4426_v17  ;;  %v3583_v51 = vadd.f32 %v4428_v50, %v666_v21  ;;  %v3586_v12 = vadd.f32 %v4429_v52, %v667_v20  ;;  %v4432_v49 = vld [vmem:[#allocation12_spill] sm:$0xff]  ;;  %v4435_v23 = vld [vmem:[#allocation77_spill] sm:$0xff] }
 0x117   : > { %4425 = vst [vmem:[#allocation16_spill] sm:$0xff] %v3577_v31  ;;  %v3589_v9 = vadd.f32 %v888_v59, %v4430_v53  ;;  %v3592_v25 = vadd.f32 %v889_v30, %v4432_v49  ;;  %v4434_v29 = vld [vmem:[#allocation76_spill] sm:$0xff]  ;;  %v3598_v62 = vadd.f32 %v4435_v23, %v665_v60  ;;  %v452_v6 = vmul.f32 %v2964_v45, %v341_v2  ;;  %v4437_v17 = vld [vmem:[#allocation21_spill] sm:$0xff]  ;;  %v4438_v30 = vld [vmem:[#allocation22_spill] sm:$0xff]  ;;  %v966_v4 = vpop.permute.xlu1 %965 }
 0x118   : > { %4427 = vst [vmem:[#allocation17_spill] sm:$0xff] %v3580_v57  ;;  %v3595_v58 = vadd.f32 %v4434_v29, %v664_v10  ;;  %v453_v21 = vmul.f32 %v2966_v46, %v341_v2  ;;  %v454_v55 = vmul.f32 %v2968_v47, %v341_v2  ;;  %v455_v20 = vmul.f32 %v2970_v48, %v341_v2  ;;  %v4439_v53 = vld [vmem:[#allocation23_spill] sm:$0xff]  ;;  %v4441_v57 = vld [vmem:[#allocation29_spill] sm:$0xff] }
 0x119   : > { %4431 = vst [vmem:[#allocation18_spill] sm:$0xff] %v3589_v9  ;;  %4433 = vst [vmem:[#allocation19_spill] sm:$0xff] %v3592_v25  ;;  %v896_v59 = vadd.f32 %v4436_v43, %v668_v39  ;;  %v897_v50 = vadd.f32 %v4437_v17, %v669_v56  ;;  %v898_v52 = vadd.f32 %v4438_v30, %v670_v1  ;;  %v351_v25 = vpop.permute.xlu0 %350  ;;  %v4440_v9 = vld [vmem:[#allocation28_spill] sm:$0xff]  ;;  %v4442_v43 = vld [vmem:[#allocation30_spill] sm:$0xff] }
 0x11a   : > { %v899_v10 = vadd.f32 %v4439_v53, %v671_v34  ;;  %v1060_v49 = vmul.f32 %v3170_v19, %v962_v16  ;;  %v1061_v60 = vmul.f32 %v3176_v27, %v962_v16  ;;  %v1062_v29 = vmul.f32 %v3178_v18, %v962_v16  ;;  %v4443_v17 = vld [vmem:[#allocation31_spill] sm:$0xff] }
 0x11b   : > { %v1063_v23 = vmul.f32 %v3180_v28, %v962_v16  ;;  %v680_v2 = vadd.f32 %v4440_v9, %v452_v6  ;;  %v681_v39 = vadd.f32 %v4441_v57, %v453_v21  ;;  %v682_v56 = vadd.f32 %v4442_v43, %v454_v55  ;;  %v974_v6 = vpop.permute.xlu1 %973  ;;  %v4447_v22 = vld [vmem:[#allocation39_spill] sm:$0xff] }
 0x11c   : > { %v683_v1 = vadd.f32 %v4443_v17, %v455_v20  ;;  %v460_v34 = vmul.f32 %v2964_v45, %v351_v25  ;;  %v461_v30 = vmul.f32 %v2966_v46, %v351_v25  ;;  %v462_v53 = vmul.f32 %v2968_v47, %v351_v25  ;;  %v4444_v17 = vld [vmem:[#allocation36_spill] sm:$0xff] }
 0x11d   : > { %v463_v41 = vmul.f32 %v2970_v48, %v351_v25  ;;  %v3621_v16 = vmul.f32 %v3170_v19, %v966_v4  ;;  %v3624_v31 = vmul.f32 %v3176_v27, %v966_v4  ;;  %v3627_v57 = vmul.f32 %v3178_v18, %v966_v4  ;;  %v361_v21 = vpop.permute.xlu0 %360 }
 0x11e   : > { %v3630_v9 = vmul.f32 %v3180_v28, %v966_v4  ;;  %v3632_v55 = vadd.f32 %v1060_v49, %v896_v59  ;;  %v3634_v20 = vadd.f32 %v1061_v60, %v897_v50  ;;  %v3636_v43 = vadd.f32 %v1062_v29, %v898_v52  ;;  %v4448_v52 = vld [vmem:[#allocation24_spill] sm:$0xff]  ;;  %v4450_v29 = vld [vmem:[#allocation26_spill] sm:$0xff] }
 0x11f   : > { %v3638_v25 = vadd.f32 %v1063_v23, %v899_v10  ;;  %v688_v3 = vadd.f32 %v4444_v17, %v460_v34  ;;  %v689_v7 = vadd.f32 %v4445_v40, %v461_v30  ;;  %v690_v42 = vadd.f32 %v4446_v61, %v462_v53  ;;  %v4449_v10 = vld [vmem:[#allocation25_spill] sm:$0xff]  ;;  %v4451_v34 = vld [vmem:[#allocation27_spill] sm:$0xff]  ;;  %v982_v53 = vpop.permute.xlu1 %981 }
 0x120   : > { %v691_v35 = vadd.f32 %v4447_v22, %v463_v41  ;;  %v468_v4 = vmul.f32 %v2964_v45, %v361_v21  ;;  %v469_v26 = vmul.f32 %v2966_v46, %v361_v21  ;;  %v470_v59 = vmul.f32 %v2968_v47, %v361_v21 }
 0x121   : > { %v471_v50 = vmul.f32 %v2970_v48, %v361_v21  ;;  %v908_v49 = vadd.f32 %v4448_v52, %v680_v2  ;;  %v909_v60 = vadd.f32 %v4449_v10, %v681_v39  ;;  %v910_v23 = vadd.f32 %v4450_v29, %v682_v56  ;;  %v371_v17 = vpop.permute.xlu0 %370  ;;  %v4453_v2 = vld [vmem:[#allocation45_spill] sm:$0xff]  ;;  %v4454_v39 = vld [vmem:[#allocation46_spill] sm:$0xff] }
 0x122   : > { %v911_v40 = vadd.f32 %v4451_v34, %v683_v1  ;;  %v1072_v61 = vmul.f32 %v3170_v19, %v974_v6  ;;  %v1073_v41 = vmul.f32 %v3176_v27, %v974_v6  ;;  %v1074_v22 = vmul.f32 %v3178_v18, %v974_v6  ;;  %v4455_v1 = vld [vmem:[#allocation47_spill] sm:$0xff] }
 0x123   : > { %v1075_v30 = vmul.f32 %v3180_v28, %v974_v6  ;;  %v3657_v21 = vadd.f32 %v4452_v33, %v468_v4  ;;  %v3660_v52 = vadd.f32 %v4453_v2, %v469_v26  ;;  %v3663_v56 = vadd.f32 %v4454_v39, %v470_v59  ;;  %v990_v2 = vpop.permute.xlu1 %989 }
 0x124   : > { %v3666_v10 = vadd.f32 %v4455_v1, %v471_v50  ;;  %v476_v29 = vmul.f32 %v2964_v45, %v371_v17  ;;  %v477_v34 = vmul.f32 %v2966_v46, %v371_v17  ;;  %v478_v6 = vmul.f32 %v2968_v47, %v371_v17 }
 0x125   : > { %v479_v32 = vmul.f32 %v2970_v48, %v371_v17  ;;  %v1080_v33 = vmul.f32 %v3170_v19, %v982_v53  ;;  %v1081_v4 = vmul.f32 %v3176_v27, %v982_v53  ;;  %v1082_v26 = vmul.f32 %v3178_v18, %v982_v53  ;;  %v381_v39 = vpop.permute.xlu0 %380 }
 0x126   : > { %v1083_v59 = vmul.f32 %v3180_v28, %v982_v53  ;;  %v3676_v50 = vadd.f32 %v1072_v61, %v908_v49  ;;  %v3678_v1 = vadd.f32 %v1073_v41, %v909_v60  ;;  %v3680_v11 = vadd.f32 %v1074_v22, %v910_v23  ;;  %v4459_v53 = vld [vmem:[#allocation55_spill] sm:$0xff]  ;;  %v4460_v61 = vld [vmem:[#allocation32_spill] sm:$0xff]  ;;  %v4461_v41 = vld [vmem:[#allocation33_spill] sm:$0xff] }
 0x127   : > { %v3682_v54 = vadd.f32 %v1075_v30, %v911_v40  ;;  %v3685_v17 = vadd.f32 %v4456_v8, %v476_v29  ;;  %v3688_v14 = vadd.f32 %v4457_v15, %v477_v34  ;;  %v3691_v38 = vadd.f32 %v4458_v13, %v478_v6  ;;  %v4462_v15 = vld [vmem:[#allocation34_spill] sm:$0xff]  ;;  %v4463_v29 = vld [vmem:[#allocation35_spill] sm:$0xff] }
 0x128   : > { %v3694_v0 = vadd.f32 %v4459_v53, %v479_v32  ;;  %v484_v49 = vmul.f32 %v2964_v45, %v381_v39  ;;  %v485_v60 = vmul.f32 %v2966_v46, %v381_v39  ;;  %v486_v23 = vmul.f32 %v2968_v47, %v381_v39 }
 0x129   : > { %v487_v40 = vmul.f32 %v2970_v48, %v381_v39  ;;  %v916_v8 = vadd.f32 %v4460_v61, %v688_v3  ;;  %v917_v22 = vadd.f32 %v4461_v41, %v689_v7  ;;  %v918_v30 = vadd.f32 %v4462_v15, %v690_v42  ;;  %v998_v39 = vpop.permute.xlu1 %997  ;;  %v391_v3 = vpop.permute.xlu0 %390  ;;  %v4464_v61 = vld [vmem:[#allocation60_spill] sm:$0xff]  ;;  %v4466_v42 = vld [vmem:[#allocation61_spill] sm:$0xff] }
 0x12a   : > { %v919_v13 = vadd.f32 %v4463_v29, %v691_v35  ;;  %v3705_v34 = vmul.f32 %v3170_v19, %v990_v2  ;;  %v3708_v32 = vmul.f32 %v3176_v27, %v990_v2  ;;  %v3711_v6 = vmul.f32 %v3178_v18, %v990_v2  ;;  %v4468_v35 = vld [vmem:[#allocation62_spill] sm:$0xff]  ;;  %v4470_v29 = vld [vmem:[#allocation63_spill] sm:$0xff] }
 0x12b   : > { %v3714_v53 = vmul.f32 %v3180_v28, %v990_v2  ;;  %v3717_v7 = vadd.f32 %v4464_v61, %v484_v49  ;;  %v3720_v41 = vadd.f32 %v4466_v42, %v485_v60  ;;  %v3723_v15 = vadd.f32 %v4468_v35, %v486_v23 }
 0x12c   : > { %v3726_v63 = vadd.f32 %v4470_v29, %v487_v40  ;;  %v492_v36 = vmul.f32 %v2964_v45, %v391_v3  ;;  %v493_v37 = vmul.f32 %v2966_v46, %v391_v3  ;;  %v494_v2 = vmul.f32 %v2968_v47, %v391_v3  ;;  %v4472_v29 = vld [vmem:[#allocation68_spill] sm:$0xff] }
 0x12d   : > { %4465 = vst [vmem:[#allocation9_spill] sm:$0xff] %v3717_v7  ;;  %4467 = vst [vmem:[#allocation10_spill] sm:$0xff] %v3720_v41  ;;  %v495_v24 = vmul.f32 %v2970_v48, %v391_v3  ;;  %v3733_v49 = vmul.f32 %v3170_v19, %v998_v39  ;;  %v3736_v60 = vmul.f32 %v3176_v27, %v998_v39  ;;  %v1006_v61 = vpop.permute.xlu1 %1005  ;;  %v1208_v45 = vpop.permute.xlu0 %1207  ;;  %v4473_v3 = vld [vmem:[#allocation69_spill] sm:$0xff]  ;;  %v4475_v7 = vld [vmem:[#allocation71_spill] sm:$0xff] }
 0x12e   : > { %4469 = vst [vmem:[#allocation78_spill] sm:$0xff] %v3723_v15  ;;  %4471 = vst [vmem:[#allocation79_spill] sm:$0xff] %v3726_v63  ;;  %v3739_v23 = vmul.f32 %v3178_v18, %v998_v39  ;;  %v3742_v40 = vmul.f32 %v3180_v28, %v998_v39  ;;  %v1144_v42 = vadd.f32 %v1080_v33, %v916_v8  ;;  %v4474_v15 = vld [vmem:[#allocation70_spill] sm:$0xff] }
 0x12f   : > { %v1145_v46 = vadd.f32 %v1081_v4, %v917_v22  ;;  %v1146_v35 = vadd.f32 %v1082_v26, %v918_v30  ;;  %v1147_v47 = vadd.f32 %v1083_v59, %v919_v13  ;;  %v3745_v48 = vadd.f32 %v4472_v29, %v492_v36  ;;  %v4476_v36 = vld [vmem:[#allocation72_spill] sm:$0xff]  ;;  %v4478_v8 = vld [vmem:[#allocation74_spill] sm:$0xff] }
 0x130   : > { %v3748_v63 = vadd.f32 %v4473_v3, %v493_v37  ;;  %v3751_v41 = vadd.f32 %v4474_v15, %v494_v2  ;;  %v3754_v44 = vadd.f32 %v4475_v7, %v495_v24  ;;  %v1284_v39 = vadd.f32 %v1208_v45, %v3632_v55  ;;  %v4477_v37 = vld [vmem:[#allocation73_spill] sm:$0xff]  ;;  %v4479_v24 = vld [vmem:[#allocation75_spill] sm:$0xff] }
 0x131   : > { %v1285_v5 = vadd.f32 %v1208_v45, %v3634_v20  ;;  %v1286_v33 = vadd.f32 %v1208_v45, %v3636_v43  ;;  %v1287_v4 = vadd.f32 %v1208_v45, %v3638_v25  ;;  %v1120_v26 = vadd.f32 %v4476_v36, %v3595_v58  ;;  %v1014_v20 = vpop.permute.xlu1 %1013  ;;  %v1223_v15 = vpop.permute.xlu0 %1222  ;;  %v4480_v43 = vld [vmem:[#allocation40_spill] sm:$0xff]  ;;  %v4481_v3 = vld [vmem:[#allocation41_spill] sm:$0xff] }
 0x132   : > { %v1121_v59 = vadd.f32 %v4477_v37, %v3598_v62  ;;  %v1122_v22 = vadd.f32 %v4478_v8, %v3583_v51  ;;  %v1123_v30 = vadd.f32 %v4479_v24, %v3586_v12  ;;  %v1348_v13 = vmax.f32 %v1284_v39, 1e-06 }
 0x133   : > { %v1349_v55 = vmax.f32 %v1285_v5, 1e-06  ;;  %v1350_v7 = vmax.f32 %v1286_v33, 1e-06  ;;  %v924_v25 = vadd.f32 %v4480_v43, %v3657_v21  ;;  %v3771_v2 = vmul.f32 %v3170_v19, %v1006_v61 }
 0x134   : > { %v3774_v58 = vmul.f32 %v3176_v27, %v1006_v61  ;;  %v3777_v62 = vmul.f32 %v3178_v18, %v1006_v61  ;;  %v1351_v51 = vmax.f32 %v1287_v4, 1e-06  ;;  %v3780_v12 = vmul.f32 %v3180_v28, %v1006_v61  ;;  %v4482_v4 = vld [vmem:[#allocation42_spill] sm:$0xff] }
 0x135   : > { %2295 = vlog2.f32 %v1348_v13  ;;  %v1296_v5 = vadd.f32 %v1223_v15, %v3676_v50  ;;  %v1297_v45 = vadd.f32 %v1223_v15, %v3678_v1  ;;  %v1298_v21 = vadd.f32 %v1223_v15, %v3680_v11  ;;  %v1233_v50 = vpop.permute.xlu0 %1232  ;;  %v4483_v1 = vld [vmem:[#allocation43_spill] sm:$0xff] }
 0x136   : > { %2297 = vlog2.f32 %v1349_v55  ;;  %v1299_v29 = vadd.f32 %v1223_v15, %v3682_v54  ;;  %v925_v39 = vadd.f32 %v4481_v3, %v3660_v52  ;;  %v926_v61 = vadd.f32 %v4482_v4, %v3663_v56  ;;  %v1203_v55 = vpop.permute.xlu1 %1202 }
 0x137   : > { %2299 = vlog2.f32 %v1350_v7  ;;  %v1360_v33 = vmax.f32 %v1296_v5, 1e-06  ;;  %v1361_v36 = vmax.f32 %v1297_v45, 1e-06  ;;  %v1362_v37 = vmax.f32 %v1298_v21, 1e-06 }
 0x138   : > { %2301 = vlog2.f32 %v1351_v51  ;;  %v1363_v8 = vmax.f32 %v1299_v29, 1e-06  ;;  %v927_v24 = vadd.f32 %v4483_v1, %v3666_v10  ;;  %v1304_v11 = vadd.f32 %v1233_v50, %v1144_v42 }
 0x139   : > { %2303 = vlog2.f32 %v1360_v33  ;;  %v1305_v13 = vadd.f32 %v1233_v50, %v1145_v46  ;;  %v1306_v54 = vadd.f32 %v1233_v50, %v1146_v35  ;;  %v1307_v52 = vadd.f32 %v1233_v50, %v1147_v47  ;;  %v4484_v50 = vld [vmem:[#allocation15_spill] sm:$0xff] }
 0x13a   : > { %2305 = vlog2.f32 %v1361_v36  ;;  %v1280_v7 = vadd.f32 %v1203_v55, %v1120_v26  ;;  %v1281_v15 = vadd.f32 %v1203_v55, %v1121_v59  ;;  %v1368_v43 = vmax.f32 %v1304_v11, 1e-06  ;;  %v1243_v26 = vpop.permute.xlu0 %1242 }
 0x13b   : > { %2307 = vlog2.f32 %v1362_v37  ;;  %v1369_v5 = vmax.f32 %v1305_v13, 1e-06  ;;  %v1370_v56 = vmax.f32 %v1306_v54, 1e-06  ;;  %v1371_v51 = vmax.f32 %v1307_v52, 1e-06 }
 0x13c   : > { %2309 = vlog2.f32 %v1363_v8  ;;  %v1282_v45 = vadd.f32 %v1203_v55, %v1122_v22  ;;  %v1283_v21 = vadd.f32 %v1203_v55, %v1123_v30  ;;  %v3793_v29 = vmul.f32 %v3170_v19, %v1014_v20 }
 0x13d   : > { %v3796_v10 = vmul.f32 %v3176_v27, %v1014_v20  ;;  %2311 = vlog2.f32 %v1368_v43  ;;  %v1344_v42 = vmax.f32 %v1280_v7, 1e-06  ;;  %v3799_v46 = vmul.f32 %v3178_v18, %v1014_v20 }
 0x13e   : > { %v3802_v35 = vmul.f32 %v3180_v28, %v1014_v20  ;;  %2313 = vlog2.f32 %v1369_v5  ;;  %v1345_v47 = vmax.f32 %v1281_v15, 1e-06  ;;  %v1346_v22 = vmax.f32 %v1282_v45, 1e-06 }
 0x13f   : > { %v2296_v59 = vpop.eup %2295  ;;  %2315 = vlog2.f32 %v1370_v56  ;;  %v1347_v30 = vmax.f32 %v1283_v21, 1e-06  ;;  %v1152_v19 = vadd.f32 %v3705_v34, %v924_v25  ;;  %v1153_v33 = vadd.f32 %v3708_v32, %v925_v39  ;;  %v4485_v32 = vld [vmem:[#allocation82_spill] sm:$0xff] }
 0x140   : > { %v2298_v3 = vpop.eup %2297  ;;  %v1417_v27 = vmul.f32 0.6931472, %v2296_v59  ;;  %2317 = vlog2.f32 %v1371_v51  ;;  %v1154_v18 = vadd.f32 %v3711_v6, %v926_v61  ;;  %v1155_v28 = vadd.f32 %v3714_v53, %v927_v24 }
 0x141   : > { %v2300_v36 = vpop.eup %2299  ;;  %v1419_v4 = vmul.f32 0.6931472, %v2298_v3  ;;  %2319 = vlog2.f32 %v1344_v42  ;;  %v1312_v20 = vadd.f32 %v1243_v26, %v1152_v19  ;;  %v3809_v11 = vadd.f32 %v1243_v26, %v1153_v33 }
 0x142   : > { %v2302_v37 = vpop.eup %2301  ;;  %v1421_v8 = vmul.f32 0.6931472, %v2300_v36  ;;  %v1541_v1 = vmul.f32 %v4484_v50, %v1417_v27  ;;  %2321 = vlog2.f32 %v1345_v47  ;;  %v3814_v6 = vadd.f32 %v3621_v16, %v4485_v32 }
 0x143   : > { %v2304_v34 = vpop.eup %2303  ;;  %v1423_v25 = vmul.f32 0.6931472, %v2302_v37  ;;  %v1542_v13 = vmul.f32 %v4484_v50, %v1419_v4  ;;  %2323 = vlog2.f32 %v1346_v22  ;;  %v3817_v54 = vadd.f32 %v1243_v26, %v1154_v18 }
 0x144   : > { %v2306_v39 = vpop.eup %2305  ;;  %v1543_v53 = vmul.f32 %v4484_v50, %v1421_v8  ;;  %v1609_v61 = vmul.f32 1.442695, %v1541_v1  ;;  %v1441_v24 = vmul.f32 0.6931472, %v2304_v34  ;;  %v3819_v15 = vadd.f32 %v1243_v26, %v1155_v28 }
 0x145   : > { %v2308_v55 = vpop.eup %2307  ;;  %v1611_v52 = vmul.f32 1.442695, %v1542_v13  ;;  %v1443_v7 = vmul.f32 0.6931472, %v2306_v39  ;;  %v1376_v43 = vmax.f32 %v1312_v20, 1e-06  ;;  %2325 = vlog2.f32 %v1347_v30 }
 0x146   : > { %v2310_v5 = vpop.eup %2309  ;;  %v1613_v56 = vmul.f32 1.442695, %v1543_v53  ;;  %v1445_v51 = vmul.f32 0.6931472, %v2308_v55  ;;  %v1553_v45 = vmul.f32 %v4484_v50, %v1441_v24  ;;  %v1544_v21 = vmul.f32 %v4484_v50, %v1423_v25 }
 0x147   : > { %v2312_v16 = vpop.eup %2311  ;;  %2327 = vpow2.f32 %v1609_v61  ;;  %v1554_v42 = vmul.f32 %v4484_v50, %v1443_v7  ;;  %v1377_v47 = vmax.f32 %v3809_v11, 1e-06  ;;  %v1378_v30 = vmax.f32 %v3817_v54, 1e-06 }
 0x148   : > { %v2314_v59 = vpop.eup %2313  ;;  %2329 = vpow2.f32 %v1611_v52  ;;  %v1555_v26 = vmul.f32 %v4484_v50, %v1445_v51  ;;  %v1633_v22 = vmul.f32 1.442695, %v1553_v45  ;;  %v1457_v19 = vmul.f32 0.6931472, %v2312_v16 }
 0x149   : > { %v2316_v3 = vpop.eup %2315  ;;  %2331 = vpow2.f32 %v1613_v56  ;;  %v1635_v27 = vmul.f32 1.442695, %v1554_v42  ;;  %v1459_v33 = vmul.f32 0.6931472, %v2314_v59  ;;  %v1447_v37 = vmul.f32 0.6931472, %v2310_v5  ;;  %v1213_v56 = vpop.permute.xlu1 %1212 }
 0x14a   : > { %v2318_v18 = vpop.eup %2317  ;;  %2333 = vpow2.f32 %v1633_v22  ;;  %v1637_v36 = vmul.f32 1.442695, %v1555_v26  ;;  %v1461_v4 = vmul.f32 0.6931472, %v2316_v3  ;;  %v1561_v28 = vmul.f32 %v4484_v50, %v1457_v19  ;;  %v4486_v59 = vld [vmem:[#allocation83_spill] sm:$0xff]  ;;  %v4487_v22 = vld [vmem:[#allocation80_spill] sm:$0xff] }
 0x14b   : > { %v2320_v20 = vpop.eup %2319  ;;  %2335 = vpow2.f32 %v1635_v27  ;;  %v1463_v8 = vmul.f32 0.6931472, %v2318_v18  ;;  %v1562_v1 = vmul.f32 %v4484_v50, %v1459_v33  ;;  %v3830_v39 = vmul.f32 1.442695, %v1544_v21  ;;  %v4488_v27 = vld [vmem:[#allocation81_spill] sm:$0xff] }
 0x14c   : > { %v2322_v11 = vpop.eup %2321  ;;  %2337 = vpow2.f32 %v1637_v36  ;;  %v1563_v34 = vmul.f32 %v4484_v50, %v1461_v4  ;;  %v1649_v25 = vmul.f32 1.442695, %v1561_v28  ;;  %v1409_v13 = vmul.f32 0.6931472, %v2320_v20 }
 0x14d   : > { %v2324_v32 = vpop.eup %2323  ;;  %v1651_v53 = vmul.f32 1.442695, %v1562_v1  ;;  %v1411_v61 = vmul.f32 0.6931472, %v2322_v11  ;;  %2339 = vlog2.f32 %v1376_v43  ;;  %v1556_v52 = vmul.f32 %v4484_v50, %v1447_v37  ;;  %v4489_v37 = vld [vmem:[#allocation48_spill] sm:$0xff]  ;;  %v4490_v11 = vld [vmem:[#allocation49_spill] sm:$0xff] }
 0x14e   : > { %2341 = vpow2.f32 %v1649_v25  ;;  %v1653_v24 = vmul.f32 1.442695, %v1563_v34  ;;  %v1413_v54 = vmul.f32 0.6931472, %v2324_v32  ;;  %v1537_v55 = vmul.f32 %v4484_v50, %v1409_v13  ;;  %v1253_v32 = vpop.permute.xlu0 %1252 }
 0x14f   : > { %2343 = vpow2.f32 %v1651_v53  ;;  %v1538_v7 = vmul.f32 %v4484_v50, %v1411_v61  ;;  %v1379_v5 = vmax.f32 %v3819_v15, 1e-06  ;;  %v2326_v51 = vpop.eup %2325  ;;  %v1564_v45 = vmul.f32 %v4484_v50, %v1463_v8  ;;  %v4491_v53 = vld [vmem:[#allocation50_spill] sm:$0xff] }
 0x150   : > { %2345 = vpow2.f32 %v1653_v24  ;;  %v1539_v16 = vmul.f32 %v4484_v50, %v1413_v54  ;;  %v1601_v43 = vmul.f32 1.442695, %v1537_v55  ;;  %v1129_v26 = vadd.f32 %v3624_v31, %v4486_v59  ;;  %v4492_v24 = vld [vmem:[#allocation51_spill] sm:$0xff] }
 0x151   : > { %v3838_v21 = vpop.eup %2327  ;;  %v1603_v42 = vmul.f32 1.442695, %v1538_v7  ;;  %2347 = vlog2.f32 %v1377_v47  ;;  %v1130_v19 = vadd.f32 %v3627_v57, %v4487_v22  ;;  %v1131_v33 = vadd.f32 %v3630_v9, %v4488_v27  ;;  %v4494_v27 = vld [vmem:[#allocation85_spill] sm:$0xff] }
 0x152   : > { %v3844_v3 = vpop.eup %2329  ;;  %2349 = vpow2.f32 %v1601_v43  ;;  %v1605_v15 = vmul.f32 1.442695, %v1539_v16  ;;  %v1288_v18 = vadd.f32 %v1213_v56, %v3814_v6  ;;  %v3851_v4 = vmul.f32 1.442695, %v1556_v52 }
 0x153   : > { %v3849_v36 = vpop.eup %2331  ;;  %2351 = vpow2.f32 %v1603_v42  ;;  %v1289_v47 = vadd.f32 %v1213_v56, %v1129_v26  ;;  %v1290_v28 = vadd.f32 %v1213_v56, %v1130_v19  ;;  %v1291_v57 = vadd.f32 %v1213_v56, %v1131_v33  ;;  %v4493_v26 = vld [vmem:[#allocation84_spill] sm:$0xff] }
 0x154   : > { %v3853_v31 = vpop.eup %2333  ;;  %2353 = vpow2.f32 %v1605_v15  ;;  %v1352_v20 = vmax.f32 %v1288_v18, 1e-06  ;;  %v932_v8 = vadd.f32 %v4489_v37, %v3685_v17  ;;  %v933_v34 = vadd.f32 %v4490_v11, %v3688_v14  ;;  %v1218_v14 = vpop.permute.xlu1 %1217  ;;  %v4498_v11 = vld [vmem:[#allocation87_spill] sm:$0xff] }
 0x155   : > { %v3857_v1 = vpop.eup %2335  ;;  %2355 = vlog2.f32 %v1378_v30  ;;  %v1353_v9 = vmax.f32 %v1289_v47, 1e-06  ;;  %v1354_v6 = vmax.f32 %v1290_v28, 1e-06  ;;  %v3863_v13 = vmul.f32 1.442695, %v1564_v45 }
 0x156   : > { %v3861_v25 = vpop.eup %2337  ;;  %2357 = vlog2.f32 %v1379_v5  ;;  %v934_v61 = vadd.f32 %v4491_v53, %v3691_v38  ;;  %v935_v17 = vadd.f32 %v4492_v24, %v3694_v0  ;;  %v1355_v55 = vmax.f32 %v1291_v57, 1e-06  ;;  %v4495_v28 = vld [vmem:[#allocation9_spill] sm:$0xff]  ;;  %v4496_v57 = vld [vmem:[#allocation56_spill] sm:$0xff] }
 0x157   : > { %v2340_v54 = vpop.eup %2339  ;;  %2359 = vlog2.f32 %v1352_v20  ;;  %v1160_v30 = vadd.f32 %v3733_v49, %v932_v8  ;;  %v1161_v52 = vadd.f32 %v3736_v60, %v933_v34  ;;  %v1415_v16 = vmul.f32 0.6931472, %v2326_v51 }
 0x158   : > { %v3871_v7 = vpop.eup %2341  ;;  %v1473_v56 = vmul.f32 0.6931472, %v2340_v54  ;;  %2361 = vlog2.f32 %v1353_v9  ;;  %v1162_v5 = vadd.f32 %v3739_v23, %v934_v61  ;;  %v1163_v45 = vadd.f32 %v3742_v40, %v935_v17  ;;  %v4497_v9 = vld [vmem:[#allocation86_spill] sm:$0xff] }
 0x159   : > { %v3875_v38 = vpop.eup %2343  ;;  %2363 = vlog2.f32 %v1354_v6  ;;  %v1320_v0 = vadd.f32 %v1253_v32, %v1160_v30  ;;  %v1321_v43 = vadd.f32 %v1253_v32, %v1161_v52  ;;  %v1292_v22 = vadd.f32 %v1218_v14, %v4493_v26  ;;  %v4499_v54 = vld [vmem:[#allocation10_spill] sm:$0xff] }
 0x15a   : > { %v3877_v42 = vpop.eup %2345  ;;  %v1569_v49 = vmul.f32 %v4484_v50, %v1473_v56  ;;  %v1322_v60 = vadd.f32 %v1253_v32, %v1162_v5  ;;  %v1323_v59 = vadd.f32 %v1253_v32, %v1163_v45  ;;  %2365 = vlog2.f32 %v1355_v55  ;;  %v4500_v55 = vld [vmem:[#allocation57_spill] sm:$0xff]  ;;  %v4501_v52 = vld [vmem:[#allocation78_spill] sm:$0xff]  ;;  %v4503_v45 = vld [vmem:[#allocation79_spill] sm:$0xff] }
 0x15b   : > { %v2348_v19 = vpop.eup %2347  ;;  %v1384_v15 = vmax.f32 %v1320_v0, 1e-06  ;;  %v1385_v23 = vmax.f32 %v1321_v43, 1e-06  ;;  %v1293_v40 = vadd.f32 %v1218_v14, %v4494_v27  ;;  %v940_v20 = vadd.f32 %v4496_v57, %v4495_v28  ;;  %v4502_v56 = vld [vmem:[#allocation58_spill] sm:$0xff]  ;;  %v4504_v0 = vld [vmem:[#allocation59_spill] sm:$0xff] }
 0x15c   : > { %v3882_v33 = vpop.eup %2349  ;;  %v1475_v51 = vmul.f32 0.6931472, %v2348_v19  ;;  %v1665_v18 = vmul.f32 1.442695, %v1569_v49  ;;  %v1386_v47 = vmax.f32 %v1322_v60, 1e-06  ;;  %v1294_v6 = vadd.f32 %v1218_v14, %v4497_v9 }
 0x15d   : > { %v3886_v37 = vpop.eup %2351  ;;  %v1387_v8 = vmax.f32 %v1323_v59, 1e-06  ;;  %2367 = vlog2.f32 %v1384_v15  ;;  %v1295_v34 = vadd.f32 %v1218_v14, %v4498_v11  ;;  %v3893_v53 = vmul.f32 %v4484_v50, %v1415_v16 }
 0x15e   : > { %v3890_v32 = vpop.eup %2353  ;;  %v1570_v61 = vmul.f32 %v4484_v50, %v1475_v51  ;;  %2369 = vpow2.f32 %v1665_v18  ;;  %v1356_v24 = vmax.f32 %v1292_v22, 1e-06  ;;  %v941_v30 = vadd.f32 %v4500_v55, %v4499_v54  ;;  %v1263_v18 = vpop.permute.xlu0 %1262 }
 0x15f   : > { %v2356_v17 = vpop.eup %2355  ;;  %2371 = vlog2.f32 %v1385_v23  ;;  %v942_v5 = vadd.f32 %v4502_v56, %v4501_v52  ;;  %v943_v14 = vadd.f32 %v4504_v0, %v4503_v45  ;;  %v1357_v16 = vmax.f32 %v1293_v40, 1e-06 }
 0x160   : > { %v2358_v43 = vpop.eup %2357  ;;  %v1477_v49 = vmul.f32 0.6931472, %v2356_v17  ;;  %v1667_v60 = vmul.f32 1.442695, %v1570_v61  ;;  %2373 = vlog2.f32 %v1386_v47  ;;  %v1358_v26 = vmax.f32 %v1294_v6, 1e-06 }
 0x161   : > { %v2360_v59 = vpop.eup %2359  ;;  %2375 = vlog2.f32 %v1387_v8  ;;  %v1359_v22 = vmax.f32 %v1295_v34, 1e-06  ;;  %v1168_v19 = vadd.f32 %v3771_v2, %v940_v20  ;;  %v1479_v23 = vmul.f32 0.6931472, %v2358_v43 }
 0x162   : > { %v2362_v15 = vpop.eup %2361  ;;  %v1571_v27 = vmul.f32 %v4484_v50, %v1477_v49  ;;  %2377 = vpow2.f32 %v1667_v60  ;;  %v1425_v51 = vmul.f32 0.6931472, %v2360_v59  ;;  %v1169_v9 = vadd.f32 %v3774_v58, %v941_v30  ;;  %v1228_v59 = vpop.permute.xlu1 %1227 }
 0x163   : > { %v2364_v28 = vpop.eup %2363  ;;  %v1427_v57 = vmul.f32 0.6931472, %v2362_v15  ;;  %2379 = vlog2.f32 %v1356_v24  ;;  %v1170_v40 = vadd.f32 %v3777_v62, %v942_v5  ;;  %v1171_v11 = vadd.f32 %v3780_v12, %v943_v14 }
 0x164   : > { %v1669_v47 = vmul.f32 1.442695, %v1571_v27  ;;  %v1429_v8 = vmul.f32 0.6931472, %v2364_v28  ;;  %v1545_v6 = vmul.f32 %v4484_v50, %v1425_v51  ;;  %2381 = vlog2.f32 %v1357_v16  ;;  %v2366_v2 = vpop.eup %2365 }
 0x165   : > { %v1546_v20 = vmul.f32 %v4484_v50, %v1427_v57  ;;  %2383 = vlog2.f32 %v1358_v26  ;;  %v1328_v34 = vadd.f32 %v1263_v18, %v1168_v19  ;;  %v1329_v17 = vadd.f32 %v1263_v18, %v1169_v9 }
 0x166   : > { %2385 = vpow2.f32 %v1669_v47  ;;  %v1547_v61 = vmul.f32 %v4484_v50, %v1429_v8  ;;  %v1617_v24 = vmul.f32 1.442695, %v1545_v6  ;;  %v1572_v62 = vmul.f32 %v4484_v50, %v1479_v23 }
 0x167   : > { %v2368_v58 = vpop.eup %2367  ;;  %v1619_v54 = vmul.f32 1.442695, %v1546_v20  ;;  %2387 = vlog2.f32 %v1359_v22  ;;  %v1330_v55 = vadd.f32 %v1263_v18, %v1170_v40  ;;  %v1331_v5 = vadd.f32 %v1263_v18, %v1171_v11  ;;  %v4505_v40 = vld [vmem:[#allocation88_spill] sm:$0xff]  ;;  %v4506_v20 = vld [vmem:[#allocation89_spill] sm:$0xff] }
 0x168   : > { %v3911_v30 = vpop.eup %2369  ;;  %2389 = vpow2.f32 %v1617_v24  ;;  %v1621_v52 = vmul.f32 1.442695, %v1547_v61  ;;  %v1489_v56 = vmul.f32 0.6931472, %v2368_v58  ;;  %v1431_v12 = vmul.f32 0.6931472, %v2366_v2 }
 0x169   : > { %v2372_v45 = vpop.eup %2371  ;;  %2391 = vpow2.f32 %v1619_v54  ;;  %v1392_v0 = vmax.f32 %v1328_v34, 1e-06  ;;  %v1393_v14 = vmax.f32 %v1329_v17, 1e-06  ;;  %v1394_v16 = vmax.f32 %v1330_v55, 1e-06 }
 0x16a   : > { %v2374_v43 = vpop.eup %2373  ;;  %2393 = vpow2.f32 %v1621_v52  ;;  %v1491_v49 = vmul.f32 0.6931472, %v2372_v45  ;;  %v1577_v60 = vmul.f32 %v4484_v50, %v1489_v56  ;;  %v3915_v22 = vmul.f32 1.442695, %v3893_v53  ;;  %v4507_v17 = vld [vmem:[#allocation90_spill] sm:$0xff]  ;;  %v4508_v52 = vld [vmem:[#allocation91_spill] sm:$0xff] }
 0x16b   : > { %v2376_v26 = vpop.eup %2375  ;;  %v1493_v19 = vmul.f32 0.6931472, %v2374_v43  ;;  %v1395_v15 = vmax.f32 %v1331_v5, 1e-06  ;;  %2395 = vlog2.f32 %v1392_v0  ;;  %v3919_v27 = vmul.f32 1.442695, %v1572_v62 }
 0x16c   : > { %v3917_v23 = vpop.eup %2377  ;;  %v1578_v51 = vmul.f32 %v4484_v50, %v1491_v49  ;;  %v1681_v18 = vmul.f32 1.442695, %v1577_v60  ;;  %2397 = vlog2.f32 %v1393_v14  ;;  %v1548_v57 = vmul.f32 %v4484_v50, %v1431_v12 }
 0x16d   : > { %v2380_v28 = vpop.eup %2379  ;;  %v1579_v9 = vmul.f32 %v4484_v50, %v1493_v19  ;;  %2399 = vlog2.f32 %v1394_v16  ;;  %v1300_v53 = vadd.f32 %v1228_v59, %v4505_v40  ;;  %v1495_v8 = vmul.f32 0.6931472, %v2376_v26 }
 0x16e   : > { %v2382_v47 = vpop.eup %2381  ;;  %v1683_v6 = vmul.f32 1.442695, %v1578_v51  ;;  %v1433_v2 = vmul.f32 0.6931472, %v2380_v28  ;;  %v1301_v11 = vadd.f32 %v1228_v59, %v4506_v20  ;;  %2401 = vlog2.f32 %v1395_v15  ;;  %v4513_v20 = vld [vmem:[#allocation67_spill] sm:$0xff] }
 0x16f   : > { %v2384_v34 = vpop.eup %2383  ;;  %v1685_v61 = vmul.f32 1.442695, %v1579_v9  ;;  %v1435_v24 = vmul.f32 0.6931472, %v2382_v47  ;;  %v1302_v58 = vadd.f32 %v1228_v59, %v4507_v17  ;;  %2403 = vpow2.f32 %v1681_v18  ;;  %v4511_v9 = vld [vmem:[#allocation65_spill] sm:$0xff] }
 0x170   : > { %v3927_v62 = vpop.eup %2385  ;;  %v1437_v54 = vmul.f32 0.6931472, %v2384_v34  ;;  %v1549_v55 = vmul.f32 %v4484_v50, %v1433_v2  ;;  %v1303_v56 = vadd.f32 %v1228_v59, %v4508_v52  ;;  %v3931_v45 = vmul.f32 1.442695, %v1548_v57  ;;  %v4510_v59 = vld [vmem:[#allocation64_spill] sm:$0xff]  ;;  %v1238_v52 = vpop.permute.xlu1 %1237 }
 0x171   : > { %v2388_v5 = vpop.eup %2387  ;;  %2405 = vpow2.f32 %v1683_v6  ;;  %v1550_v12 = vmul.f32 %v4484_v50, %v1435_v24  ;;  %v1364_v0 = vmax.f32 %v1300_v53, 1e-06  ;;  %v1580_v26 = vmul.f32 %v4484_v50, %v1495_v8  ;;  %v1273_v6 = vpop.permute.xlu0 %1272  ;;  %v4512_v8 = vld [vmem:[#allocation66_spill] sm:$0xff] }
 0x172   : > { %4509 = vst [vmem:[#allocation11_spill] sm:$0xff] %v3931_v45  ;;  %v3934_v14 = vpop.eup %2389  ;;  %2407 = vpow2.f32 %v1685_v61  ;;  %v1439_v43 = vmul.f32 0.6931472, %v2388_v5  ;;  %v1551_v49 = vmul.f32 %v4484_v50, %v1437_v54  ;;  %v1625_v60 = vmul.f32 1.442695, %v1549_v55 }
 0x173   : > { %v3937_v16 = vpop.eup %2391  ;;  %v1365_v19 = vmax.f32 %v1301_v11, 1e-06  ;;  %2409 = vlog2.f32 %v1364_v0  ;;  %v948_v15 = vadd.f32 %v4510_v59, %v3745_v48  ;;  %v1627_v18 = vmul.f32 1.442695, %v1550_v12  ;;  %v4514_v59 = vld [vmem:[#allocation96_spill] sm:$0xff] }
 0x174   : > { %v3942_v51 = vpop.eup %2393  ;;  %v1366_v28 = vmax.f32 %v1302_v58, 1e-06  ;;  %v1367_v57 = vmax.f32 %v1303_v56, 1e-06  ;;  %v949_v40 = vadd.f32 %v4511_v9, %v3748_v63  ;;  %v1552_v47 = vmul.f32 %v4484_v50, %v1439_v43 }
 0x175   : > { %v2396_v53 = vpop.eup %2395  ;;  %2411 = vpow2.f32 %v1625_v60  ;;  %v950_v2 = vadd.f32 %v4512_v8, %v3751_v41  ;;  %v951_v11 = vadd.f32 %v4513_v20, %v3754_v44  ;;  %v1629_v34 = vmul.f32 1.442695, %v1551_v49  ;;  %v4515_v8 = vld [vmem:[#allocation97_spill] sm:$0xff]  ;;  %v4516_v20 = vld [vmem:[#allocation98_spill] sm:$0xff] }
 0x176   : > { %v2398_v48 = vpop.eup %2397  ;;  %v1505_v61 = vmul.f32 0.6931472, %v2396_v53  ;;  %v1176_v24 = vadd.f32 %v3793_v29, %v948_v15  ;;  %v1177_v17 = vadd.f32 %v3796_v10, %v949_v40  ;;  %2413 = vlog2.f32 %v1365_v19 }
 0x177   : > { %v2400_v58 = vpop.eup %2399  ;;  %v1507_v63 = vmul.f32 0.6931472, %v2398_v48  ;;  %v1178_v54 = vadd.f32 %v3799_v46, %v950_v2  ;;  %v1179_v55 = vadd.f32 %v3802_v35, %v951_v11  ;;  %2415 = vlog2.f32 %v1366_v28  ;;  %v1248_v11 = vpop.permute.xlu1 %1247 }
 0x178   : > { %v1509_v56 = vmul.f32 0.6931472, %v2400_v58  ;;  %v1585_v41 = vmul.f32 %v4484_v50, %v1505_v61  ;;  %v1336_v44 = vadd.f32 %v1273_v6, %v1176_v24  ;;  %v2402_v5 = vpop.eup %2401  ;;  %2417 = vlog2.f32 %v1367_v57  ;;  %v4517_v61 = vld [vmem:[#allocation99_spill] sm:$0xff] }
 0x179   : > { %v1586_v12 = vmul.f32 %v4484_v50, %v1507_v63  ;;  %v1337_v29 = vadd.f32 %v1273_v6, %v1177_v17  ;;  %v1338_v0 = vadd.f32 %v1273_v6, %v1178_v54  ;;  %v3957_v10 = vpop.eup %2403  ;;  %2419 = vpow2.f32 %v1627_v18 }
 0x17a   : > { %v1587_v43 = vmul.f32 %v4484_v50, %v1509_v56  ;;  %v1697_v46 = vmul.f32 1.442695, %v1585_v41  ;;  %v1339_v49 = vadd.f32 %v1273_v6, %v1179_v55  ;;  %2421 = vpow2.f32 %v1629_v34  ;;  %v4520_v41 = vld [vmem:[#allocation108_spill] sm:$0xff] }
 0x17b   : > { %v3960_v35 = vpop.eup %2405  ;;  %v1699_v60 = vmul.f32 1.442695, %v1586_v12  ;;  %v1400_v19 = vmax.f32 %v1336_v44, 1e-06  ;;  %v1308_v15 = vadd.f32 %v1238_v52, %v4514_v59  ;;  %v1511_v9 = vmul.f32 0.6931472, %v2402_v5 }
 0x17c   : > { %v3963_v28 = vpop.eup %2407  ;;  %2423 = vpow2.f32 %v1697_v46  ;;  %v1701_v57 = vmul.f32 1.442695, %v1587_v43  ;;  %v1401_v40 = vmax.f32 %v1337_v29, 1e-06  ;;  %v1402_v18 = vmax.f32 %v1338_v0, 1e-06 }
 0x17d   : > { %v2410_v53 = vpop.eup %2409  ;;  %2425 = vpow2.f32 %v1699_v60  ;;  %v1309_v2 = vadd.f32 %v1238_v52, %v4515_v8  ;;  %v1310_v6 = vadd.f32 %v1238_v52, %v4516_v20  ;;  %v1403_v34 = vmax.f32 %v1339_v49, 1e-06  ;;  %v1258_v8 = vpop.permute.xlu1 %1257 }
 0x17e   : > { %2427 = vpow2.f32 %v1701_v57  ;;  %v1449_v48 = vmul.f32 0.6931472, %v2410_v53  ;;  %v1311_v24 = vadd.f32 %v1238_v52, %v4517_v61  ;;  %v3970_v58 = vmul.f32 1.442695, %v1580_v26  ;;  %v4526_v61 = vld [vmem:[#allocation8_spill] sm:$0xff] }
 0x17f   : > { %v3968_v17 = vpop.eup %2411  ;;  %v3972_v63 = vmul.f32 1.442695, %v1552_v47  ;;  %2429 = vlog2.f32 %v1400_v19  ;;  %v1372_v54 = vmax.f32 %v1308_v15, 1e-06  ;;  %v3975_v55 = vmul.f32 %v4484_v50, %v1511_v9  ;;  %v4521_v47 = vld [vmem:[#allocation109_spill] sm:$0xff]  ;;  %v4522_v19 = vld [vmem:[#allocation110_spill] sm:$0xff] }
 0x180   : > { %4518 = vst [vmem:[#allocation12_spill] sm:$0xff] %v3970_v58  ;;  %v1557_v56 = vmul.f32 %v4484_v50, %v1449_v48  ;;  %2431 = vlog2.f32 %v1401_v40  ;;  %v1316_v44 = vadd.f32 %v1248_v11, %v4520_v41  ;;  %v2414_v5 = vpop.eup %2413  ;;  %v1373_v12 = vmax.f32 %v1309_v2, 1e-06  ;;  %v4523_v15 = vld [vmem:[#allocation111_spill] sm:$0xff]  ;;  %v4525_v48 = vld [vmem:[#allocation92_spill] sm:$0xff] }
 0x181   : > { %4519 = vst [vmem:[#allocation76_spill] sm:$0xff] %v3972_v63  ;;  %2433 = vlog2.f32 %v1402_v18  ;;  %v1374_v52 = vmax.f32 %v1310_v6, 1e-06  ;;  %v1375_v29 = vmax.f32 %v1311_v24, 1e-06  ;;  %v2416_v0 = vpop.eup %2415  ;;  %v1317_v46 = vadd.f32 %v1248_v11, %v4521_v47  ;;  %v4524_v6 = vld [vmem:[#allocation7_spill] sm:$0xff] }
 0x182   : > { %v1451_v26 = vmul.f32 0.6931472, %v2414_v5  ;;  %v1641_v43 = vmul.f32 1.442695, %v1557_v56  ;;  %2435 = vlog2.f32 %v1403_v34  ;;  %v2418_v49 = vpop.eup %2417  ;;  %v1453_v60 = vmul.f32 0.6931472, %v2416_v0 }
 0x183   : > { %2437 = vlog2.f32 %v1372_v54  ;;  %v1318_v59 = vadd.f32 %v1248_v11, %v4522_v19  ;;  %v1319_v9 = vadd.f32 %v1248_v11, %v4523_v15  ;;  %v3982_v57 = vpop.eup %2419  ;;  %v1455_v40 = vmul.f32 0.6931472, %v2418_v49  ;;  %v4527_v24 = vld [vmem:[#allocation93_spill] sm:$0xff]  ;;  %v4528_v5 = vld [vmem:[#allocation104_spill] sm:$0xff]  ;;  %v4529_v0 = vld [vmem:[#allocation94_spill] sm:$0xff] }
 0x184   : > { %v1558_v53 = vmul.f32 %v4484_v50, %v1451_v26  ;;  %2439 = vpow2.f32 %v1641_v43  ;;  %v1380_v18 = vmax.f32 %v1316_v44, 1e-06  ;;  %v3985_v2 = vpop.eup %2421  ;;  %v1559_v20 = vmul.f32 %v4484_v50, %v1453_v60  ;;  %v4530_v47 = vld [vmem:[#allocation105_spill] sm:$0xff] }
 0x185   : > { %2441 = vlog2.f32 %v1373_v12  ;;  %v1164_v34 = vadd.f32 %v4525_v48, %v4524_v6  ;;  %v1165_v54 = vadd.f32 %v4527_v24, %v4526_v61  ;;  %v1381_v41 = vmax.f32 %v1317_v46, 1e-06  ;;  %v4531_v12 = vld [vmem:[#allocation95_spill] sm:$0xff]  ;;  %v4533_v61 = vld [vmem:[#allocation16_spill] sm:$0xff] }
 0x186   : > { %v3992_v11 = vpop.eup %2423  ;;  %v1643_v56 = vmul.f32 1.442695, %v1558_v53  ;;  %2443 = vlog2.f32 %v1374_v52  ;;  %v1166_v44 = vadd.f32 %v4529_v0, %v4528_v5  ;;  %v1645_v43 = vmul.f32 1.442695, %v1559_v20  ;;  %v4534_v24 = vld [vmem:[#allocation100_spill] sm:$0xff] }
 0x187   : > { %v3996_v26 = vpop.eup %2425  ;;  %2445 = vlog2.f32 %v1375_v29  ;;  %v1167_v49 = vadd.f32 %v4531_v12, %v4530_v47  ;;  %v1324_v60 = vadd.f32 %v1258_v8, %v1164_v34  ;;  %v1382_v15 = vmax.f32 %v1318_v59, 1e-06  ;;  %v4535_v59 = vld [vmem:[#allocation17_spill] sm:$0xff] }
 0x188   : > { %v4000_v19 = vpop.eup %2427  ;;  %2447 = vpow2.f32 %v1643_v56  ;;  %v1383_v6 = vmax.f32 %v1319_v9, 1e-06  ;;  %v1325_v48 = vadd.f32 %v1258_v8, %v1165_v54  ;;  %v1560_v52 = vmul.f32 %v4484_v50, %v1455_v40  ;;  %v4536_v9 = vld [vmem:[#allocation101_spill] sm:$0xff] }
 0x189   : > { %4532 = vst [vmem:[#allocation77_spill] sm:$0xff] %v4000_v19  ;;  %v2430_v53 = vpop.eup %2429  ;;  %2449 = vpow2.f32 %v1645_v43  ;;  %v1326_v46 = vadd.f32 %v1258_v8, %v1166_v44  ;;  %v1172_v5 = vadd.f32 %v4534_v24, %v4533_v61  ;;  %v1327_v0 = vadd.f32 %v1258_v8, %v1167_v49  ;;  %v1268_v44 = vpop.permute.xlu1 %1267  ;;  %v4537_v43 = vld [vmem:[#allocation114_spill] sm:$0xff]  ;;  %v4539_v49 = vld [vmem:[#allocation115_spill] sm:$0xff] }
 0x18a   : > { %v2432_v20 = vpop.eup %2431  ;;  %v1521_v29 = vmul.f32 0.6931472, %v2430_v53  ;;  %2451 = vlog2.f32 %v1380_v18  ;;  %v1388_v47 = vmax.f32 %v1324_v60, 1e-06  ;;  %v1389_v56 = vmax.f32 %v1325_v48, 1e-06 }
 0x18b   : > { %v2434_v34 = vpop.eup %2433  ;;  %v1523_v12 = vmul.f32 0.6931472, %v2432_v20  ;;  %2453 = vlog2.f32 %v1381_v41  ;;  %v1173_v54 = vadd.f32 %v4536_v9, %v4535_v59  ;;  %v4538_v61 = vld [vmem:[#allocation102_spill] sm:$0xff]  ;;  %v1390_v8 = vmax.f32 %v1326_v46, 1e-06  ;;  %v4540_v41 = vld [vmem:[#allocation103_spill] sm:$0xff] }
 0x18c   : > { %v2436_v63 = vpop.eup %2435  ;;  %v1525_v58 = vmul.f32 0.6931472, %v2434_v34  ;;  %v1593_v40 = vmul.f32 %v4484_v50, %v1521_v29  ;;  %2455 = vlog2.f32 %v1382_v15  ;;  %v1174_v24 = vadd.f32 %v4538_v61, %v4537_v43 }
 0x18d   : > { %v2438_v53 = vpop.eup %2437  ;;  %v1594_v18 = vmul.f32 %v4484_v50, %v1523_v12  ;;  %2457 = vlog2.f32 %v1383_v6  ;;  %v1175_v60 = vadd.f32 %v4540_v41, %v4539_v49  ;;  %v1527_v29 = vmul.f32 0.6931472, %v2436_v63 }
 0x18e   : > { %v4013_v48 = vpop.eup %2439  ;;  %v1595_v20 = vmul.f32 %v4484_v50, %v1525_v58  ;;  %v1713_v34 = vmul.f32 1.442695, %v1593_v40  ;;  %v1465_v59 = vmul.f32 0.6931472, %v2438_v53  ;;  %2459 = vlog2.f32 %v1388_v47 }
 0x18f   : > { %v2442_v15 = vpop.eup %2441  ;;  %v1715_v9 = vmul.f32 1.442695, %v1594_v18  ;;  %2461 = vlog2.f32 %v1389_v56  ;;  %v1332_v43 = vadd.f32 %v1268_v44, %v1172_v5  ;;  %v1391_v41 = vmax.f32 %v1327_v0, 1e-06 }
 0x190   : > { %v2444_v61 = vpop.eup %2443  ;;  %2463 = vpow2.f32 %v1713_v34  ;;  %v1717_v12 = vmul.f32 1.442695, %v1595_v20  ;;  %v1467_v6 = vmul.f32 0.6931472, %v2442_v15  ;;  %v1565_v46 = vmul.f32 %v4484_v50, %v1465_v59 }
 0x191   : > { %v2446_v45 = vpop.eup %2445  ;;  %2465 = vpow2.f32 %v1715_v9  ;;  %v1469_v49 = vmul.f32 0.6931472, %v2444_v61  ;;  %v1333_v19 = vadd.f32 %v1268_v44, %v1173_v54  ;;  %v4020_v47 = vmul.f32 1.442695, %v3975_v55 }
 0x192   : > { %v4017_v58 = vpop.eup %2447  ;;  %2467 = vpow2.f32 %v1717_v12  ;;  %v1566_v63 = vmul.f32 %v4484_v50, %v1467_v6  ;;  %v1657_v5 = vmul.f32 1.442695, %v1565_v46  ;;  %v1596_v40 = vmul.f32 %v4484_v50, %v1527_v29 }
 0x193   : > { %v4023_v56 = vpop.eup %2449  ;;  %v1567_v53 = vmul.f32 %v4484_v50, %v1469_v49  ;;  %2469 = vlog2.f32 %v1390_v8  ;;  %v1334_v18 = vadd.f32 %v1268_v44, %v1174_v24  ;;  %v4027_v0 = vmul.f32 1.442695, %v1560_v52 }
 0x194   : > { %v2452_v20 = vpop.eup %2451  ;;  %2471 = vpow2.f32 %v1657_v5  ;;  %v1659_v54 = vmul.f32 1.442695, %v1566_v63  ;;  %v1396_v34 = vmax.f32 %v1332_v43, 1e-06  ;;  %v1397_v9 = vmax.f32 %v1333_v19, 1e-06 }
 0x195   : > { %v2454_v55 = vpop.eup %2453  ;;  %v1661_v59 = vmul.f32 1.442695, %v1567_v53  ;;  %v1481_v15 = vmul.f32 0.6931472, %v2452_v20  ;;  %2473 = vlog2.f32 %v1391_v41  ;;  %v1335_v6 = vadd.f32 %v1268_v44, %v1175_v60 }
 0x196   : > { %v2456_v61 = vpop.eup %2455  ;;  %2475 = vpow2.f32 %v1659_v54  ;;  %v1483_v12 = vmul.f32 0.6931472, %v2454_v55  ;;  %v1398_v29 = vmax.f32 %v1334_v18, 1e-06  ;;  %v4029_v49 = vmul.f32 1.442695, %v1596_v40 }
 0x197   : > { %v2458_v46 = vpop.eup %2457  ;;  %2477 = vpow2.f32 %v1661_v59  ;;  %v1485_v24 = vmul.f32 0.6931472, %v2456_v61  ;;  %v1573_v52 = vmul.f32 %v4484_v50, %v1481_v15  ;;  %v1471_v63 = vmul.f32 0.6931472, %v2446_v45  ;;  %v1278_v15 = vpop.permute.xlu1 %1277  ;;  %v4543_v61 = vld [vmem:[#allocation106_spill] sm:$0xff] }
 0x198   : > { %4541 = vst [vmem:[#allocation20_spill] sm:$0xff] %v4029_v49  ;;  %v2460_v8 = vpop.eup %2459  ;;  %v1574_v43 = vmul.f32 %v4484_v50, %v1483_v12  ;;  %2479 = vlog2.f32 %v1396_v34  ;;  %v1750_v19 = vadd.f32 %v3844_v3, %v3838_v21  ;;  %v1399_v20 = vmax.f32 %v1335_v6, 1e-06 }
 0x199   : > { %v2462_v41 = vpop.eup %2461  ;;  %v1575_v5 = vmul.f32 %v4484_v50, %v1485_v24  ;;  %v1673_v44 = vmul.f32 1.442695, %v1573_v52  ;;  %v1497_v60 = vmul.f32 0.6931472, %v2460_v8  ;;  %2481 = vlog2.f32 %v1397_v9  ;;  %v4542_v9 = vld [vmem:[#allocation18_spill] sm:$0xff]  ;;  %v4544_v24 = vld [vmem:[#allocation19_spill] sm:$0xff] }
 0x19a   : > { %v4036_v40 = vpop.eup %2463  ;;  %v1675_v53 = vmul.f32 1.442695, %v1574_v43  ;;  %v1499_v18 = vmul.f32 0.6931472, %v2462_v41  ;;  %2483 = vlog2.f32 %v1398_v29  ;;  %v4042_v21 = vadd.f32 %v3849_v36, %v1750_v19  ;;  %v4545_v52 = vld [vmem:[#allocation107_spill] sm:$0xff]  ;;  %v4546_v43 = vld [vmem:[#allocation13_spill] sm:$0xff] }
 0x19b   : > { %v4038_v54 = vpop.eup %2465  ;;  %2485 = vpow2.f32 %v1673_v44  ;;  %v1677_v45 = vmul.f32 1.442695, %v1575_v5  ;;  %v1581_v34 = vmul.f32 %v4484_v50, %v1497_v60  ;;  %v1568_v55 = vmul.f32 %v4484_v50, %v1471_v63  ;;  %v4547_v36 = vld [vmem:[#allocation112_spill] sm:$0xff]  ;;  %v4548_v44 = vld [vmem:[#allocation14_spill] sm:$0xff]  ;;  %v4549_v60 = vld [vmem:[#allocation113_spill] sm:$0xff] }
 0x19c   : > { %v4044_v3 = vpop.eup %2467  ;;  %2487 = vpow2.f32 %v1675_v53  ;;  %v1582_v59 = vmul.f32 %v4484_v50, %v1499_v18  ;;  %v1180_v12 = vadd.f32 %v4543_v61, %v4542_v9  ;;  %v1181_v8 = vadd.f32 %v4545_v52, %v4544_v24 }
 0x19d   : > { %v2470_v6 = vpop.eup %2469  ;;  %2489 = vpow2.f32 %v1677_v45  ;;  %v1689_v29 = vmul.f32 1.442695, %v1581_v34  ;;  %v1182_v19 = vadd.f32 %v4547_v36, %v4546_v43  ;;  %v1183_v53 = vadd.f32 %v4549_v60, %v4548_v44 }
 0x19e   : > { %v4054_v41 = vpop.eup %2471  ;;  %v1501_v5 = vmul.f32 0.6931472, %v2470_v6  ;;  %v1691_v63 = vmul.f32 1.442695, %v1582_v59  ;;  %2491 = vlog2.f32 %v1399_v20  ;;  %v1340_v9 = vadd.f32 %v1278_v15, %v1180_v12 }
 0x19f   : > { %v2474_v18 = vpop.eup %2473  ;;  %2493 = vpow2.f32 %v1689_v29  ;;  %v1341_v61 = vadd.f32 %v1278_v15, %v1181_v8  ;;  %v1342_v45 = vadd.f32 %v1278_v15, %v1182_v19  ;;  %v1487_v49 = vmul.f32 0.6931472, %v2458_v46 }
 0x1a0   : > { %v4058_v34 = vpop.eup %2475  ;;  %v1583_v24 = vmul.f32 %v4484_v50, %v1501_v5  ;;  %2495 = vpow2.f32 %v1691_v63  ;;  %v1343_v52 = vadd.f32 %v1278_v15, %v1183_v53  ;;  %v4063_v6 = vmul.f32 1.442695, %v1568_v55 }
 0x1a1   : > { %v4061_v43 = vpop.eup %2477  ;;  %2497 = vpow2.f32 %v3830_v39  ;;  %v1404_v20 = vmax.f32 %v1340_v9, 1e-06  ;;  %v1405_v59 = vmax.f32 %v1341_v61, 1e-06  ;;  %v1406_v12 = vmax.f32 %v1342_v45, 1e-06 }
 0x1a2   : > { %v2480_v36 = vpop.eup %2479  ;;  %v1693_v29 = vmul.f32 1.442695, %v1583_v24  ;;  %v1407_v8 = vmax.f32 %v1343_v52, 1e-06  ;;  %2499 = vpow2.f32 %v3851_v4  ;;  %v1765_v15 = vadd.f32 %v3857_v1, %v3853_v31 }
 0x1a3   : > { %v2482_v19 = vpop.eup %2481  ;;  %v1513_v46 = vmul.f32 0.6931472, %v2480_v36  ;;  %2501 = vlog2.f32 %v1404_v20  ;;  %v1775_v55 = vadd.f32 %v3875_v38, %v3871_v7  ;;  %v4072_v39 = vmul.f32 %v4484_v50, %v1487_v49 }
 0x1a4   : > { %v2484_v5 = vpop.eup %2483  ;;  %2503 = vpow2.f32 %v1693_v29  ;;  %v1515_v63 = vmul.f32 0.6931472, %v2482_v19  ;;  %v1745_v44 = vadd.f32 %v3886_v37, %v3882_v33  ;;  %v1766_v9 = vadd.f32 %v3861_v25, %v1765_v15 }
 0x1a5   : > { %v2486_v60 = vpop.eup %2485  ;;  %v1517_v4 = vmul.f32 0.6931472, %v2484_v5  ;;  %v1589_v53 = vmul.f32 %v4484_v50, %v1513_v46  ;;  %2505 = vlog2.f32 %v1405_v59  ;;  %v4080_v7 = vadd.f32 %v3877_v42, %v1775_v55  ;;  %v4553_v5 = vld [vmem:[#allocation76_spill] sm:$0xff] }
 0x1a6   : > { %v2488_v31 = vpop.eup %2487  ;;  %v1590_v1 = vmul.f32 %v4484_v50, %v1515_v63  ;;  %2507 = vlog2.f32 %v1406_v12  ;;  %v4083_v38 = vadd.f32 %v3890_v32, %v1745_v44  ;;  %v1785_v61 = vadd.f32 %v3917_v23, %v3911_v30 }
 0x1a7   : > { %v2490_v49 = vpop.eup %2489  ;;  %v1591_v33 = vmul.f32 %v4484_v50, %v1517_v4  ;;  %v1705_v37 = vmul.f32 1.442695, %v1589_v53  ;;  %2509 = vlog2.f32 %v1407_v8  ;;  %v1755_v24 = vadd.f32 %v3937_v16, %v3934_v14 }
 0x1a8   : > { %v2492_v45 = vpop.eup %2491  ;;  %v1707_v25 = vmul.f32 1.442695, %v1590_v1  ;;  %2511 = vpow2.f32 %v3863_v13  ;;  %v1795_v42 = vadd.f32 %v3960_v35, %v3957_v10  ;;  %v1503_v52 = vmul.f32 0.6931472, %v2474_v18  ;;  %v4554_v1 = vld [vmem:[#allocation20_spill] sm:$0xff] }
 0x1a9   : > { %v2494_v32 = vpop.eup %2493  ;;  %2513 = vpow2.f32 %v1705_v37  ;;  %v1709_v20 = vmul.f32 1.442695, %v1591_v33  ;;  %v4094_v59 = vadd.f32 %v3927_v62, %v1785_v61  ;;  %v4097_v30 = vadd.f32 %v3942_v51, %v1755_v24 }
 0x1aa   : > { %v2496_v36 = vpop.eup %2495  ;;  %2515 = vpow2.f32 %v1707_v25  ;;  %v4100_v13 = vadd.f32 %v3963_v28, %v1795_v42  ;;  %v1760_v23 = vadd.f32 %v3982_v57, %v3968_v17  ;;  %v1519_v16 = vmul.f32 0.6931472, %v2492_v45 }
 0x1ab   : > { %v2498_v14 = vpop.eup %2497  ;;  %2517 = vpow2.f32 %v1709_v20  ;;  %v1805_v10 = vadd.f32 %v3996_v26, %v3992_v11  ;;  %v1770_v62 = vadd.f32 %v4017_v58, %v4013_v48  ;;  %v1815_v28 = vadd.f32 %v4038_v54, %v4036_v40  ;;  %v4550_v11 = vld [vmem:[#allocation77_spill] sm:$0xff]  ;;  %v4552_v54 = vld [vmem:[#allocation12_spill] sm:$0xff] }
 0x1ac   : > { %v2500_v35 = vpop.eup %2499  ;;  %v1752_v18 = vadd.f32 %v2498_v14, %v4042_v21  ;;  %2519 = vpow2.f32 %v3915_v22  ;;  %v4111_v51 = vadd.f32 %v3985_v2, %v1760_v23  ;;  %v1584_v57 = vmul.f32 %v4484_v50, %v1503_v52  ;;  %v4551_v21 = vld [vmem:[#allocation11_spill] sm:$0xff] }
 0x1ad   : > { %v2502_v17 = vpop.eup %2501  ;;  %v1767_v29 = vadd.f32 %v2500_v35, %v1766_v9  ;;  %2521 = vpow2.f32 %v3919_v27  ;;  %v4118_v26 = vadd.f32 %v4550_v11, %v1805_v10  ;;  %v4122_v22 = vadd.f32 %v4023_v56, %v1770_v62 }
 0x1ae   : > { %v2504_v48 = vpop.eup %2503  ;;  %1753 = vadd.xlane.f32.xlu1 %v1752_v18  ;;  %v1529_v58 = vmul.f32 0.6931472, %v2502_v17  ;;  %2523 = vpow2.f32 %v4551_v21  ;;  %v4125_v2 = vadd.f32 %v4044_v3, %v1815_v28  ;;  %v1780_v27 = vadd.f32 %v4058_v34, %v4054_v41 }
 0x1af   : > { %v2506_v40 = vpop.eup %2505  ;;  %2525 = vpow2.f32 %v4552_v54  ;;  %v1790_v12 = vadd.f32 %v2488_v31, %v2486_v60  ;;  %v1800_v8 = vadd.f32 %v2496_v36, %v2494_v32  ;;  %v1592_v46 = vmul.f32 %v4484_v50, %v1519_v16 }
 0x1b0   : > { %v2508_v19 = vpop.eup %2507  ;;  %v1531_v15 = vmul.f32 0.6931472, %v2506_v40  ;;  %v1597_v55 = vmul.f32 %v4484_v50, %v1529_v58  ;;  %2527 = vpow2.f32 %v4553_v5  ;;  %v1781_v3 = vadd.f32 %v4061_v43, %v1780_v27 }
 0x1b1   : > { %v2510_v56 = vpop.eup %2509  ;;  %v1533_v63 = vmul.f32 0.6931472, %v2508_v19  ;;  %2529 = vpow2.f32 %v4020_v47  ;;  %v1791_v44 = vadd.f32 %v2490_v49, %v1790_v12  ;;  %v1801_v33 = vadd.f32 %v2504_v48, %v1800_v8  ;;  %v1733_v8 = vld [vmem:[#allocation2 + $0x20] sm:$0xff] }
 0x1b2   : > { %v2512_v4 = vpop.eup %2511  ;;  %v1535_v53 = vmul.f32 0.6931472, %v2510_v56  ;;  %v1598_v41 = vmul.f32 %v4484_v50, %v1531_v15  ;;  %v1721_v34 = vmul.f32 1.442695, %v1597_v55  ;;  %1768 = vadd.xlane.f32.xlu1 %v1767_v29  ;;  %2531 = vpow2.f32 %v4027_v0  ;;  %v1735_v15 = vld [vmem:[#allocation2 + $0x30] sm:$0xff]  ;;  %v1729_v56 = vld [vmem:[#allocation2] sm:$0xff] }
 0x1b3   : > { %v2514_v60 = vpop.eup %2513  ;;  %v1599_v9 = vmul.f32 %v4484_v50, %v1533_v63  ;;  %v1777_v31 = vadd.f32 %v2512_v4, %v4080_v7  ;;  %2533 = vpow2.f32 %v4554_v1  ;;  %v1679_v43 = vmul.f32 1.442695, %v4072_v39  ;;  %v1737_v63 = vld [vmem:[#allocation2 + $0x40] sm:$0xff] }
 0x1b4   : > { %v2516_v47 = vpop.eup %2515  ;;  %v1600_v49 = vmul.f32 %v4484_v50, %v1535_v53  ;;  %2535 = vpow2.f32 %v1721_v34  ;;  %v1723_v37 = vmul.f32 1.442695, %v1598_v41  ;;  %v1695_v45 = vmul.f32 1.442695, %v1584_v57  ;;  %v1731_v41 = vld [vmem:[#allocation2 + $0x10] sm:$0xff] }
 0x1b5   : > { %v2518_v61 = vpop.eup %2517  ;;  %v1725_v25 = vmul.f32 1.442695, %v1599_v9  ;;  %2537 = vpow2.f32 %v4063_v6  ;;  %v1810_v0 = vadd.f32 %v2516_v47, %v2514_v60  ;;  %v1711_v42 = vmul.f32 1.442695, %v1592_v46  ;;  %v1739_v34 = vld [vmem:[#allocation2 + $0x50] sm:$0xff]  ;;  %v1741_v47 = vld [vmem:[#allocation2 + $0x60] sm:$0xff] }
 0x1b6   : > { %v2520_v24 = vpop.eup %2519  ;;  %2539 = vpow2.f32 %v1723_v37  ;;  %1778 = vadd.xlane.f32.xlu1 %v1777_v31  ;;  %v1727_v32 = vmul.f32 1.442695, %v1600_v49 }
 0x1b7   : > { %v2522_v7 = vpop.eup %2521  ;;  %2541 = vpow2.f32 %v1725_v25  ;;  %v1747_v52 = vadd.f32 %v2520_v24, %v4083_v38  ;;  %v1811_v39 = vadd.f32 %v2518_v61, %v1810_v0  ;;  %v1743_v25 = vld [vmem:[#allocation2 + $0x70] sm:$0xff] }
 0x1b8   : > { %v2524_v20 = vpop.eup %2523  ;;  %v1787_v50 = vadd.f32 %v2522_v7, %v4094_v59  ;;  %2543 = vpow2.f32 %v1679_v43 }
 0x1b9   : > { %v2526_v36 = vpop.eup %2525  ;;  %1748 = vadd.xlane.f32.xlu0 %v1747_v52  ;;  %v1757_v23 = vadd.f32 %v2524_v20, %v4097_v30  ;;  %2545 = vpow2.f32 %v1695_v45  ;;  %v1734_v45 = vld [vmem:[#allocation2 + $0x28] sm:$0xff] }
 0x1ba   : > { %v2528_v6 = vpop.eup %2527  ;;  %1788 = vadd.xlane.f32.xlu1 %v1787_v50  ;;  %v1797_v14 = vadd.f32 %v2526_v36, %v4100_v13  ;;  %2547 = vpow2.f32 %v1711_v42  ;;  %v1738_v20 = vld [vmem:[#allocation2 + $0x48] sm:$0xff] }
 0x1bb   : > { %v2530_v16 = vpop.eup %2529  ;;  %v1762_v10 = vadd.f32 %v2528_v6, %v4111_v51  ;;  %2549 = vpow2.f32 %v1727_v32  ;;  %v1736_v32 = vld [vmem:[#allocation2 + $0x38] sm:$0xff] }
 0x1bc   : > { %v2532_v38 = vpop.eup %2531  ;;  %v1807_v62 = vadd.f32 %v2530_v16, %v4118_v26  ;;  %v1742_v16 = vld [vmem:[#allocation2 + $0x68] sm:$0xff] }
 0x1bd   : > { %v2534_v35 = vpop.eup %2533  ;;  %1758 = vadd.xlane.f32.xlu0 %v1757_v23  ;;  %v1772_v59 = vadd.f32 %v2532_v38, %v4122_v22  ;;  %v1740_v23 = vld [vmem:[#allocation2 + $0x58] sm:$0xff] }
 0x1be   : > { %v2536_v18 = vpop.eup %2535  ;;  %1798 = vadd.xlane.f32.xlu1 %v1797_v14  ;;  %v1817_v30 = vadd.f32 %v2534_v35, %v4125_v2  ;;  %v1730_v2 = vld [vmem:[#allocation2 + $0x8] sm:$0xff] }
 0x1bf   : > { %v2538_v28 = vpop.eup %2537 }
 0x1c0   : > { %v2540_v17 = vpop.eup %2539  ;;  %v1782_v57 = vadd.f32 %v2538_v28, %v1781_v3 }
 0x1c1   : > { %v2542_v13 = vpop.eup %2541  ;;  %1763 = vadd.xlane.f32.xlu0 %v1762_v10  ;;  %v1820_v29 = vadd.f32 %v2540_v17, %v2536_v18  ;;  %v2720_v17 = vmov (!%p2205_p1), 0  }
 0x1c2   : > { %v2544_v11 = vpop.eup %2543  ;;  %1808 = vadd.xlane.f32.xlu1 %v1807_v62  ;;  %v1744_v62 = vld [vmem:[#allocation2 + $0x78] sm:$0xff]  ;;  %2551 = vset.pattern.permute.xlu0 (!%p2205_p1), %v2720_v17 }
 0x1c3   : > { %v2546_v51 = vpop.eup %2545  ;;  %v1792_v48 = vadd.f32 %v2544_v11, %v1791_v44  ;;  %v1821_v58 = vadd.f32 %v2542_v13, %v1820_v29  ;;  %2552 = vset.pattern.permute.xlu1 (!%p2205_p1), %v2720_v17 }
 0x1c4   : > { %v2548_v26 = vpop.eup %2547  ;;  %v1802_v21 = vadd.f32 %v2546_v51, %v1801_v33  ;;  %v1732_v33 = vld [vmem:[#allocation2 + $0x18] sm:$0xff] }
 0x1c5   : > { %v2550_v40 = vpop.eup %2549  ;;  %1773 = vadd.xlane.f32.xlu0 %v1772_v59  ;;  %v1812_v22 = vadd.f32 %v2548_v26, %v1811_v39 }
 0x1c6   : > { %1818 = vadd.xlane.f32.xlu1 %v1817_v30  ;;  %v1822_v54 = vadd.f32 %v2550_v40, %v1821_v58  ;;  %v4555_v58 = vld [vmem:[#allocation15_spill] sm:$0xff] (!%p2205_p1) }
 0x1c7   : > { %2553 = vrcp.f32 (!%p2205_p1), %v4555_v58 }
 0x1c9   : > { %1783 = vadd.xlane.f32.xlu0 %v1782_v57 }
 0x1cd   : > { %1793 = vadd.xlane.f32.xlu0 %v1792_v48 }
 0x1d1   : > { %1803 = vadd.xlane.f32.xlu0 %v1802_v21 }
 0x1d5   : > { %1813 = vadd.xlane.f32.xlu0 %v1812_v22 }
 0x1d9   : > { %1823 = vadd.xlane.f32.xlu0 %v1822_v54 }
 0x23b   : > { %v1754_v27 = vpop.xlane.xlu1 %1753 }
 0x23c   : > { %v1826_v12 = vadd.f32 %v1754_v27, %v1730_v2 }
 0x23e   : > { %1843 = vst.msk [vmem:[#allocation2 + $0x8] sm:$0xff] %vm1841_vm1, %v1826_v12 }
 0x23f   : > { %v1769_v19 = vpop.xlane.xlu1 %1768 }
 0x240   : > { %v1829_v46 = vadd.f32 %v1769_v19, %v1733_v8 }
 0x242   : > { %1846 = vst.msk [vmem:[#allocation2 + $0x20] sm:$0xff] %vm1841_vm1, %v1829_v46 }
 0x243   : > { %v1779_v55 = vpop.xlane.xlu1 %1778 }
 0x244   : > { %v1831_v5 = vadd.f32 %v1779_v55, %v1735_v15 }
 0x245   : > { %v1863_v11 = vld [vmem:[#allocation2 + $0x8] sm:$0xff] (!%p2205_p1) }
 0x246   : > { %1848 = vst.msk [vmem:[#allocation2 + $0x30] sm:$0xff] %vm1841_vm1, %v1831_v5  ;;  %v1749_v3 = vpop.xlane.xlu0 %1748  ;;  %v1879_v26 = vmul.f32 (!%p2205_p1), 0.0009765625, %v1863_v11 }
 0x247   : > { %v1825_v44 = vadd.f32 %v1749_v3, %v1729_v56  ;;  %v1789_v4 = vpop.xlane.xlu1 %1788 }
 0x248   : > { %v1833_v53 = vadd.f32 %v1789_v4, %v1737_v63  ;;  %v4169_v4 = vpop.eup (!%p2205_p1), %2553 }
 0x249   : > { %1842 = vst.msk [vmem:[#allocation2] sm:$0xff] %vm1841_vm1, %v1825_v44  ;;  %v1866_v48 = vld [vmem:[#allocation2 + $0x20] sm:$0xff] (!%p2205_p1) }
 0x24a   : > { %1850 = vst.msk [vmem:[#allocation2 + $0x40] sm:$0xff] %vm1841_vm1, %v1833_v53  ;;  %v1759_v60 = vpop.xlane.xlu0 %1758  ;;  %v1882_v54 = vmul.f32 (!%p2205_p1), 0.0009765625, %v1866_v48 }
 0x24b   : > { %v1827_v9 = vadd.f32 %v1759_v60, %v1731_v41  ;;  %v1799_v31 = vpop.xlane.xlu1 %1798 }
 0x24c   : > { %v1835_v1 = vadd.f32 %v1799_v31, %v1739_v34 }
 0x24d   : > { %1844 = vst.msk [vmem:[#allocation2 + $0x10] sm:$0xff] %vm1841_vm1, %v1827_v9  ;;  %v1868_v22 = vld [vmem:[#allocation2 + $0x30] sm:$0xff] (!%p2205_p1) }
 0x24e   : > { %1852 = vst.msk [vmem:[#allocation2 + $0x50] sm:$0xff] %vm1841_vm1, %v1835_v1  ;;  %v1764_v43 = vpop.xlane.xlu0 %1763  ;;  %v1884_v8 = vmul.f32 (!%p2205_p1), 0.0009765625, %v1868_v22 }
 0x24f   : > { %v1828_v49 = vadd.f32 %v1764_v43, %v1732_v33  ;;  %v1809_v37 = vpop.xlane.xlu1 %1808 }
 0x250   : > { %v1837_v61 = vadd.f32 %v1809_v37, %v1741_v47  ;;  %v1862_v30 = vld [vmem:[#allocation2] sm:$0xff] (!%p2205_p1) }
 0x251   : > { %1845 = vst.msk [vmem:[#allocation2 + $0x18] sm:$0xff] %vm1841_vm1, %v1828_v49  ;;  %v1878_v13 = vmul.f32 (!%p2205_p1), 0.0009765625, %v1862_v30  ;;  %v1870_v12 = vld [vmem:[#allocation2 + $0x40] sm:$0xff] (!%p2205_p1) }
 0x252   : > { %1854 = vst.msk [vmem:[#allocation2 + $0x60] sm:$0xff] %vm1841_vm1, %v1837_v61  ;;  %v1774_v0 = vpop.xlane.xlu0 %1773  ;;  %v1886_v55 = vmul.f32 (!%p2205_p1), 0.0009765625, %v1870_v12 }
 0x253   : > { %v1830_v24 = vadd.f32 %v1774_v0, %v1734_v45  ;;  %v1819_v42 = vpop.xlane.xlu1 %1818 }
 0x254   : > { %v1839_v7 = vadd.f32 %v1819_v42, %v1743_v25  ;;  %v1864_v18 = vld [vmem:[#allocation2 + $0x10] sm:$0xff] (!%p2205_p1) }
 0x255   : > { %1847 = vst.msk [vmem:[#allocation2 + $0x28] sm:$0xff] %vm1841_vm1, %v1830_v24  ;;  %v1880_v57 = vmul.f32 (!%p2205_p1), 0.0009765625, %v1864_v18  ;;  %v1872_v15 = vld [vmem:[#allocation2 + $0x50] sm:$0xff] (!%p2205_p1) }
 0x256   : > { %1856 = vst.msk [vmem:[#allocation2 + $0x70] sm:$0xff] %vm1841_vm1, %v1839_v7  ;;  %v1784_v52 = vpop.xlane.xlu0 %1783  ;;  %v1888_v63 = vmul.f32 (!%p2205_p1), 0.0009765625, %v1872_v15 }
 0x257   : > { %v1832_v39 = vadd.f32 %v1784_v52, %v1736_v32  ;;  %2555 = vlog2.f32 (!%p2205_p1), %v1880_v57 }
 0x258   : > { %v1865_v28 = vld [vmem:[#allocation2 + $0x18] sm:$0xff] (!%p2205_p1)  ;;  %2557 = vlog2.f32 (!%p2205_p1), %v1878_v13 }
 0x259   : > { %1849 = vst.msk [vmem:[#allocation2 + $0x38] sm:$0xff] %vm1841_vm1, %v1832_v39  ;;  %v1881_v29 = vmul.f32 (!%p2205_p1), 0.0009765625, %v1865_v28  ;;  %v1874_v3 = vld [vmem:[#allocation2 + $0x60] sm:$0xff] (!%p2205_p1) }
 0x25a   : > { %v1794_v50 = vpop.xlane.xlu0 %1793  ;;  %v1890_v60 = vmul.f32 (!%p2205_p1), 0.0009765625, %v1874_v3 }
 0x25b   : > { %v1834_v36 = vadd.f32 %v1794_v50, %v1738_v20  ;;  %2559 = vlog2.f32 (!%p2205_p1), %v1881_v29 }
 0x25c   : > { %v1867_v51 = vld [vmem:[#allocation2 + $0x28] sm:$0xff] (!%p2205_p1)  ;;  %2561 = vlog2.f32 (!%p2205_p1), %v1879_v26 }
 0x25d   : > { %1851 = vst.msk [vmem:[#allocation2 + $0x48] sm:$0xff] %vm1841_vm1, %v1834_v36  ;;  %v1883_v40 = vmul.f32 (!%p2205_p1), 0.0009765625, %v1867_v51  ;;  %v1876_v41 = vld [vmem:[#allocation2 + $0x70] sm:$0xff] (!%p2205_p1) }
 0x25e   : > { %v1804_v6 = vpop.xlane.xlu0 %1803  ;;  %v1892_v43 = vmul.f32 (!%p2205_p1), 0.0009765625, %v1876_v41 }
 0x25f   : > { %v1836_v14 = vadd.f32 %v1804_v6, %v1740_v23  ;;  %2563 = vlog2.f32 (!%p2205_p1), %v1883_v40 }
 0x260   : > { %v1869_v21 = vld [vmem:[#allocation2 + $0x38] sm:$0xff] (!%p2205_p1)  ;;  %2565 = vlog2.f32 (!%p2205_p1), %v1882_v54 }
 0x261   : > { %1853 = vst.msk [vmem:[#allocation2 + $0x58] sm:$0xff] %vm1841_vm1, %v1836_v14  ;;  %v1885_v27 = vmul.f32 (!%p2205_p1), 0.0009765625, %v1869_v21  ;;  %v2556_v34 = vpop.eup (!%p2205_p1), %2555 }
 0x262   : > { %v1814_v10 = vpop.xlane.xlu0 %1813  ;;  %v2558_v9 = vpop.eup (!%p2205_p1), %2557  ;;  %v1899_v31 = vmul.f32 (!%p2205_p1), 0.6931472, %v2556_v34 }
 0x263   : > { %v1838_v38 = vadd.f32 %v1814_v10, %v1742_v16  ;;  %1861 = sbr.rel (%p2205_p1) target bundleno = 820 (0x334), region = 52  ;;  %2567 = vlog2.f32 (!%p2205_p1), %v1885_v27  ;;  %v1895_v47 = vmul.f32 (!%p2205_p1), 0.6931472, %v2558_v9 }
 0x264   : > { %v1871_v2 = vld [vmem:[#allocation2 + $0x48] sm:$0xff] (!%p2205_p1)  ;;  %2569 = vlog2.f32 (!%p2205_p1), %v1884_v8  ;;  %v1929_v37 = vmul.f32 (!%p2205_p1), %v4169_v4, %v1899_v31 }
 0x265   : > { %1855 = vst.msk [vmem:[#allocation2 + $0x68] sm:$0xff] %vm1841_vm1, %v1838_v38  ;;  %v1887_v46 = vmul.f32 (!%p2205_p1), 0.0009765625, %v1871_v2  ;;  %v2560_v33 = vpop.eup (!%p2205_p1), %2559  ;;  %v1927_v25 = vmul.f32 (!%p2205_p1), %v4169_v4, %v1895_v47 }
 0x266   : > { %v1824_v35 = vpop.xlane.xlu0 %1823  ;;  %v2562_v49 = vpop.eup (!%p2205_p1), %2561  ;;  %v1901_v61 = vmul.f32 (!%p2205_p1), 0.6931472, %v2560_v33  ;;  %v1947_v42 = vmul.f32 (!%p2205_p1), 1.442695, %v1929_v37 }
 0x267   : > { %v1840_v59 = vadd.f32 %v1824_v35, %v1744_v62  ;;  %2571 = vlog2.f32 (!%p2205_p1), %v1887_v46  ;;  %v1897_v0 = vmul.f32 (!%p2205_p1), 0.6931472, %v2562_v49  ;;  %v1943_v39 = vmul.f32 (!%p2205_p1), 1.442695, %v1927_v25 }
 0x268   : > { %v1873_v19 = vld [vmem:[#allocation2 + $0x58] sm:$0xff] (!%p2205_p1)  ;;  %2573 = vlog2.f32 (!%p2205_p1), %v1886_v55  ;;  %v1930_v7 = vmul.f32 (!%p2205_p1), %v4169_v4, %v1901_v61 }
 0x269   : > { %1857 = vst.msk [vmem:[#allocation2 + $0x78] sm:$0xff] %vm1841_vm1, %v1840_v59  ;;  %v1889_v5 = vmul.f32 (!%p2205_p1), 0.0009765625, %v1873_v19  ;;  %v2564_v45 = vpop.eup (!%p2205_p1), %2563  ;;  %v1928_v20 = vmul.f32 (!%p2205_p1), %v4169_v4, %v1897_v0 }
 0x26a   : > { %v2566_v24 = vpop.eup %2565  ;;  %v1905_v32 = vmul.f32 0.6931472, %v2564_v45  ;;  %v1949_v23 = vmul.f32 1.442695, %v1930_v7 }
 0x26b   : > { %2575 = vlog2.f32 %v1889_v5  ;;  %v1903_v50 = vmul.f32 0.6931472, %v2566_v24  ;;  %v1945_v10 = vmul.f32 1.442695, %v1928_v20 }
 0x26c   : > { %v1875_v56 = vld [vmem:[#allocation2 + $0x68] sm:$0xff]  ;;  %2577 = vlog2.f32 %v1888_v63  ;;  %v1932_v6 = vmul.f32 %v4169_v4, %v1905_v32 }
 0x26d   : > { %v1891_v53 = vmul.f32 0.0009765625, %v1875_v56  ;;  %v2568_v52 = vpop.eup %2567  ;;  %v1931_v38 = vmul.f32 %v4169_v4, %v1903_v50  ;;  %v1975_v50 = vld [vmem:[%s4297_s4] sm:$0xff] }
 0x26e   : > { %v2570_v36 = vpop.eup %2569  ;;  %v1909_v14 = vmul.f32 0.6931472, %v2568_v52  ;;  %v1953_v59 = vmul.f32 1.442695, %v1932_v6  ;;  %v1977_v6 = vld [vmem:[%s4297_s4 + $0x10] sm:$0xff] }
 0x26f   : > { %2579 = vlog2.f32 %v1891_v53  ;;  %v1907_v62 = vmul.f32 0.6931472, %v2570_v36  ;;  %v1951_v17 = vmul.f32 1.442695, %v1931_v38  ;;  %v1976_v36 = vld [vmem:[%s4297_s4 + $0x8] sm:$0xff]  ;;  %v1978_v38 = vld [vmem:[%s4297_s4 + $0x18] sm:$0xff] }
 0x270   : > { %v1877_v44 = vld [vmem:[#allocation2 + $0x78] sm:$0xff]  ;;  %2581 = vlog2.f32 %v1890_v60  ;;  %v1934_v18 = vmul.f32 %v4169_v4, %v1909_v14 }
 0x271   : > { %v1893_v1 = vmul.f32 0.0009765625, %v1877_v44  ;;  %v2572_v16 = vpop.eup %2571  ;;  %v1933_v57 = vmul.f32 %v4169_v4, %v1907_v62 }
 0x272   : > { %v2574_v35 = vpop.eup %2573  ;;  %v1913_v30 = vmul.f32 0.6931472, %v2572_v16  ;;  %v1957_v51 = vmul.f32 1.442695, %v1934_v18  ;;  %v1979_v18 = vld [vmem:[%s4297_s4 + $0x20] sm:$0xff] }
 0x273   : > { %2583 = vlog2.f32 %v1893_v1  ;;  %v1911_v13 = vmul.f32 0.6931472, %v2574_v35  ;;  %v1955_v21 = vmul.f32 1.442695, %v1933_v57  ;;  %v1980_v57 = vld [vmem:[%s4297_s4 + $0x28] sm:$0xff] }
 0x274   : > { %2585 = vlog2.f32 %v1892_v43  ;;  %v1936_v48 = vmul.f32 %v4169_v4, %v1913_v30 }
 0x275   : > { %2587 = vpow2.f32 %v1947_v42  ;;  %v2576_v28 = vpop.eup %2575  ;;  %v1935_v40 = vmul.f32 %v4169_v4, %v1911_v13 }
 0x276   : > { %2589 = vpow2.f32 %v1943_v39  ;;  %v2578_v29 = vpop.eup %2577  ;;  %v1917_v58 = vmul.f32 0.6931472, %v2576_v28  ;;  %v1961_v12 = vmul.f32 1.442695, %v1936_v48 }
 0x277   : > { %2591 = vpow2.f32 %v1949_v23  ;;  %v1915_v22 = vmul.f32 0.6931472, %v2578_v29  ;;  %v1959_v15 = vmul.f32 1.442695, %v1935_v40 }
 0x278   : > { %2593 = vpow2.f32 %v1945_v10  ;;  %v1938_v8 = vmul.f32 %v4169_v4, %v1917_v58 }
 0x279   : > { %v2580_v11 = vpop.eup %2579  ;;  %2595 = vpow2.f32 %v1953_v59  ;;  %v1937_v55 = vmul.f32 %v4169_v4, %v1915_v22 }
 0x27a   : > { %v2582_v26 = vpop.eup %2581  ;;  %2597 = vpow2.f32 %v1951_v17  ;;  %v1921_v19 = vmul.f32 0.6931472, %v2580_v11  ;;  %v1965_v3 = vmul.f32 1.442695, %v1938_v8 }
 0x27b   : > { %2599 = vpow2.f32 %v1957_v51  ;;  %v1919_v5 = vmul.f32 0.6931472, %v2582_v26  ;;  %v1963_v41 = vmul.f32 1.442695, %v1937_v55  ;;  %v1981_v51 = vld [vmem:[%s4297_s4 + $0x30] sm:$0xff] }
 0x27c   : > { %2601 = vpow2.f32 %v1955_v21  ;;  %v1940_v44 = vmul.f32 %v4169_v4, %v1921_v19  ;;  %v1982_v21 = vld [vmem:[%s4297_s4 + $0x38] sm:$0xff]  ;;  %v1984_v19 = vld [vmem:[%s4297_s4 + $0x48] sm:$0xff] }
 0x27d   : > { %v2584_v54 = vpop.eup %2583  ;;  %2603 = vpow2.f32 %v1961_v12  ;;  %v1939_v34 = vmul.f32 %v4169_v4, %v1919_v5  ;;  %v1985_v5 = vld [vmem:[%s4297_s4 + $0x50] sm:$0xff] }
 0x27e   : > { %v2586_v2 = vpop.eup %2585  ;;  %v1925_v53 = vmul.f32 0.6931472, %v2584_v54  ;;  %2605 = vpow2.f32 %v1959_v15  ;;  %v1969_v1 = vmul.f32 1.442695, %v1940_v44  ;;  %v1986_v44 = vld [vmem:[%s4297_s4 + $0x58] sm:$0xff] }
 0x27f   : > { %v2588_v27 = vpop.eup %2587  ;;  %v1923_v60 = vmul.f32 0.6931472, %v2586_v2  ;;  %2607 = vpow2.f32 %v1965_v3  ;;  %v1967_v47 = vmul.f32 1.442695, %v1939_v34  ;;  %v1983_v2 = vld [vmem:[%s4297_s4 + $0x40] sm:$0xff] }
 0x280   : > { %v2590_v46 = vpop.eup %2589  ;;  %2003 = vperm.xlu1 %2552, %v2588_v27   ;;  %v1942_v33 = vmul.f32 %v4169_v4, %v1925_v53  ;;  %2609 = vpow2.f32 %v1963_v41 }
 0x281   : > { %v2592_v56 = vpop.eup %2591  ;;  %1993 = vperm.xlu0 %2551, %v2590_v46   ;;  %v1941_v43 = vmul.f32 %v4169_v4, %v1923_v60  ;;  %2611 = vpow2.f32 %v1969_v1  ;;  %v1987_v60 = vld [vmem:[%s4297_s4 + $0x60] sm:$0xff] }
 0x282   : > { %v2594_v63 = vpop.eup %2593  ;;  %v1973_v61 = vmul.f32 1.442695, %v1942_v33  ;;  %2613 = vpow2.f32 %v1967_v47  ;;  %v1988_v33 = vld [vmem:[%s4297_s4 + $0x68] sm:$0xff] }
 0x283   : > { %v2596_v9 = vpop.eup %2595  ;;  %v1971_v45 = vmul.f32 1.442695, %v1941_v43 }
 0x284   : > { %2008 = vperm.xlu1 %2552, %v2592_v56   ;;  %v2598_v31 = vpop.eup %2597  ;;  %2615 = vpow2.f32 %v1973_v61 }
 0x285   : > { %1998 = vperm.xlu0 %2551, %v2594_v63   ;;  %v2600_v49 = vpop.eup %2599  ;;  %2617 = vpow2.f32 %v1971_v45 }
 0x286   : > { %v2602_v37 = vpop.eup %2601 }
 0x287   : > { %v2604_v25 = vpop.eup %2603 }
 0x288   : > { %2018 = vperm.xlu1 %2552, %v2596_v9   ;;  %v2606_v0 = vpop.eup %2605 }
 0x289   : > { %2013 = vperm.xlu0 %2551, %v2598_v31   ;;  %v2608_v24 = vpop.eup %2607 }
 0x28a   : > { %v2610_v42 = vpop.eup %2609 }
 0x28b   : > { %v2612_v7 = vpop.eup %2611 }
 0x28c   : > { %2028 = vperm.xlu1 %2552, %v2600_v49   ;;  %v2614_v4 = vpop.eup %2613  ;;  %v1989_v49 = vld [vmem:[%s4297_s4 + $0x70] sm:$0xff] }
 0x28d   : > { %2023 = vperm.xlu0 %2551, %v2602_v37  }
 0x28e   : > { %v2616_v32 = vpop.eup %2615 }
 0x28f   : > { %v2618_v52 = vpop.eup %2617 }
 0x290   : > { %2038 = vperm.xlu1 %2552, %v2604_v25   ;;  %v1990_v25 = vld [vmem:[%s4297_s4 + $0x78] sm:$0xff] }
 0x291   : > { %2033 = vperm.xlu0 %2551, %v2606_v0  }
 0x294   : > { %2048 = vperm.xlu1 %2552, %v2608_v24  }
 0x295   : > { %2043 = vperm.xlu0 %2551, %v2610_v42  }
 0x298   : > { %2058 = vperm.xlu1 %2552, %v2612_v7  }
 0x299   : > { %2053 = vperm.xlu0 %2551, %v2614_v4  }
 0x29c   : > { %2068 = vperm.xlu1 %2552, %v2616_v32  }
 0x29d   : > { %2063 = vperm.xlu0 %2551, %v2618_v52  }
 0x2ff   : > { %v2004_v39 = vpop.permute.xlu1 %2003 }
 0x300   : > { %v1994_v20 = vpop.permute.xlu0 %1993  ;;  %v2073_v62 = vmul.f32 %v2004_v39, %v1977_v6 }
 0x301   : > { %v2071_v16 = vmul.f32 %v1994_v20, %v1975_v50 }
 0x303   : > { %v2009_v23 = vpop.permute.xlu1 %2008 }
 0x304   : > { %v1999_v14 = vpop.permute.xlu0 %1998  ;;  %v2074_v28 = vmul.f32 %v2009_v23, %v1978_v38  ;;  %v2108_v23 = vld [vmem:[%s4298_s5] sm:$0x1] }
 0x305   : > { %v2072_v10 = vmul.f32 %v1999_v14, %v1976_v36 }
 0x307   : > { %v2087_v35 = vadd.f32 %v2072_v10, %v2071_v16  ;;  %v2019_v59 = vpop.permute.xlu1 %2018 }
 0x308   : > { %v2014_v30 = vpop.permute.xlu0 %2013  ;;  %v2076_v58 = vmul.f32 %v2019_v59, %v1980_v57 }
 0x309   : > { %v2088_v17 = vadd.f32 %v2087_v35, %v2073_v62  ;;  %v2075_v29 = vmul.f32 %v2014_v30, %v1979_v18 }
 0x30b   : > { %v2089_v13 = vadd.f32 %v2088_v17, %v2074_v28  ;;  %v2029_v11 = vpop.permute.xlu1 %2028 }
 0x30c   : > { %v2024_v48 = vpop.permute.xlu0 %2023  ;;  %v2078_v12 = vmul.f32 %v2029_v11, %v1982_v21 }
 0x30d   : > { %v2090_v26 = vadd.f32 %v2089_v13, %v2075_v29  ;;  %v2077_v22 = vmul.f32 %v2024_v48, %v1981_v51 }
 0x30f   : > { %v2091_v40 = vadd.f32 %v2090_v26, %v2076_v58  ;;  %v2039_v54 = vpop.permute.xlu1 %2038 }
 0x310   : > { %v2034_v27 = vpop.permute.xlu0 %2033  ;;  %v2080_v63 = vmul.f32 %v2039_v54, %v1984_v19 }
 0x311   : > { %v2092_v8 = vadd.f32 %v2091_v40, %v2077_v22  ;;  %v2079_v15 = vmul.f32 %v2034_v27, %v1983_v2 }
 0x313   : > { %v2093_v46 = vadd.f32 %v2092_v8, %v2078_v12  ;;  %v2049_v55 = vpop.permute.xlu1 %2048 }
 0x314   : > { %v2044_v56 = vpop.permute.xlu0 %2043  ;;  %v2082_v31 = vmul.f32 %v2049_v55, %v1986_v44 }
 0x315   : > { %v2094_v3 = vadd.f32 %v2093_v46, %v2079_v15  ;;  %v2081_v41 = vmul.f32 %v2044_v56, %v1985_v5 }
 0x317   : > { %v2095_v53 = vadd.f32 %v2094_v3, %v2080_v63  ;;  %v2059_v34 = vpop.permute.xlu1 %2058 }
 0x318   : > { %v2054_v9 = vpop.permute.xlu0 %2053  ;;  %v2084_v61 = vmul.f32 %v2059_v34, %v1988_v33 }
 0x319   : > { %v2096_v1 = vadd.f32 %v2095_v53, %v2081_v41  ;;  %v2083_v43 = vmul.f32 %v2054_v9, %v1987_v60 }
 0x31b   : > { %v2097_v47 = vadd.f32 %v2096_v1, %v2082_v31  ;;  %v2069_v0 = vpop.permute.xlu1 %2068 }
 0x31c   : > { %v2064_v37 = vpop.permute.xlu0 %2063  ;;  %v2086_v7 = vmul.f32 %v2069_v0, %v1990_v25 }
 0x31d   : > { %v2098_v45 = vadd.f32 %v2097_v47, %v2083_v43  ;;  %v2085_v42 = vmul.f32 %v2064_v37, %v1989_v49 }
 0x31f   : > { %v2099_v24 = vadd.f32 %v2098_v45, %v2084_v61 }
 0x321   : > { %v2100_v4 = vadd.f32 %v2099_v24, %v2085_v42 }
 0x323   : > { %v2101_v32 = vadd.f32 %v2100_v4, %v2086_v7 }
 0x325   : > { %v2102_v52 = vrot.slane %v2101_v32, 4 }
 0x327   : > { %v2103_v39 = vadd.f32 %v2102_v52, %v2101_v32 }
 0x329   : > { %v2104_v20 = vrot.slane %v2103_v39, 2 }
 0x32b   : > { %v2105_v50 = vadd.f32 %v2104_v20, %v2103_v39 }
 0x32d   : > { %v2106_v36 = vrot.slane %v2105_v50, 1 }
 0x32f   : > { %v2107_v6 = vadd.f32 %v2106_v36, %v2105_v50 }
 0x331   : > { %v2109_v14 = vadd.f32 %v2108_v23, %v2107_v6 }
 0x333   : > { %2110 = vst [vmem:[%s2840_s7] sm:$0x1] %v2109_v14 }
 0x334 PF: > { %s2206_s21 = sshll.u32 %s2701_s27, 4  ;;  %s2124_s16 = sshll.u32 %s2840_s7, 4  ;;  %s2125_s16 = int_to_ptr.vmem [resolvable:$true] %s2124_s16 }
 0x335   : > { %s4243_s13 = scalar_lea.hbm %s4299_s6, %s2206_s21  ;;  %s2112_s17 = scalar_lea.sflag [#allocation5], %s266_s15 }
 0x336   : > { %s2619_s18 = scalar_lea.vmem %s2125_s16, 16  ;;  %s2721_s19 = smov [#allocation4]  }
 0x337   : > { %p2620_p2 = scmp.ne.s32.totalorder %s2125_s16, %s2619_s18  ;;  %s2623_s20 = sshll.u32 %s2721_s19, 4  ;;  %s2624_s20 = int_to_ptr.vmem [resolvable:$false] %s2623_s20 }
 0x338   : > { %s2625_s0 = scalar_lea.vmem %s2624_s20, 32  ;;  %p2626_p6 = scmp.lt.s32.totalorder %s2125_s16, %s2624_s20 }
 0x339   : > { %p2621_p4 = pnand %p2620_p2, %p2809_p3  ;;  %p2627_p7 = scmp.lt.s32.totalorder %s2625_s0, %s2619_s18 }
 0x33b   : > { %p2622_p5 = pneg %p2621_p4  ;;  %p2628_p8 = por %p2627_p7, %p2626_p6 }
 0x33d   : > { %p2629_p10 = pnand %p2628_p8, %p2622_p5 }
 0x33f   : > { %2632 = shalt.err (!%p2629_p10)
}
 0x340   : > { %s2633_s27 = scalar_lea.hbm %s4243_s13, 16  ;;  %s2637_s26 = scalar_lea.hbm %s4299_s6, 32 }
 0x341   : > { %p2634_p11 = scmp.ne.s32.totalorder %s4243_s13, %s2633_s27  ;;  %p2638_p0 = scmp.lt.u32.totalorder %s4243_s13, %s4299_s6 }
 0x342   : > { %p2639_p1 = scmp.lt.u32.totalorder %s2637_s26, %s2633_s27  ;;  %p2641_p4 = scmp.lt.u32.totalorder %s2633_s27, %s4243_s13 }
 0x343   : > { %p2635_p12 = pnand %p2634_p11, %p2809_p3 }
 0x344   : > { %p2640_p2 = por %p2639_p1, %p2638_p0 }
 0x345   : > { %p2636_p13 = pneg %p2635_p12 }
 0x346   : > { %p2642_p5 = por %p2641_p4, %p2640_p2 }
 0x348   : > { %p2643_p6 = pnand %p2642_p5, %p2636_p13 }
 0x34a   : > { %2646 = shalt.err (!%p2643_p6)
}
 0x34b   : > { %2209 = dma.vmem_to_hbm [thread:$0]  (%p2809_p3), %s2125_s16, 16, %s4243_s13, %s2112_s17  }
 0x34c PF: > { %p2215_p7 = scmp.ge.s32.totalorder %s2713_s30, 2  ;;  %s2136_s12 = sand.u32 1, %s2685_s23  }
 0x34d   : > { %s2137_s18 = scalar_lea.sflag [#allocation5], %s2136_s12 }
 0x34e   : > { %p2212_p8 = pnand %p2215_p7, %p2819_p9 }
 0x350   : > { %2680 = dma.done.wait (!%p2212_p8), %s2137_s18, 16  }
 0x351   : > { %2682 = vsyncadd (!%p2212_p8), %s2137_s18, 4294967280  ;;  %s20_s30 = sadd.s32 1, %s2713_s30   ;;  %s4556_s23 = smov %s2689_s24 }
 0x352   : > { %p17_p10 = scmp.ge.s32.totalorder %s20_s30, 6   ;;  %s4557_s24 = smov %s2693_s25 }
 0x353   : > { %s4558_s25 = smov %s2827_s14  ;;  %s4559_s26 = smov %s2705_s28 }
 0x354   : > { %s4560_s27 = smov %s2709_s29  ;;  %s4561_s28 = smov %s4564_s8 }
 0x355   : > { %s4562_s29 = smov %s4568_s9  ;;  %19 = sbr.rel (!%p17_p10) target bundleno = 7 (0x7), region = 87 }
 0x35c   :  { %2141 = vsyncpa [#allocation5], 1 }
 0x35d   :  { %2143 = vsyncpa [#allocation5 + $0x1], 1 }

</bundles_post_ra>
